<compile_context>
chip_gen: v7x
topology: tpu7x:2x2x1
jax: 0.10.0
libtpu: 0.0.40
codegen_flags: <defaults>
</compile_context>

<pallas_src>
import jax
import jax.numpy as jnp
from jax.experimental import pallas as pl
from jax.experimental.pallas import tpu as pltpu


# ----------------------------------------------------------------------------
# In-kernel LSTM cell (PyTorch gate order i, f, g, o; biases already folded into
# the hoisted input projection).
# ----------------------------------------------------------------------------

def _lstm_cell(gates, c_prev, hidden):
    """gates: (B, 4H) pre-activations. Returns (h_new, c_new), each (B, H)."""
    sig = jax.nn.sigmoid(gates)                       # full-vreg sigmoid (EUP)
    i_g = sig[:, 0 * hidden:1 * hidden]
    f_g = sig[:, 1 * hidden:2 * hidden]
    o_g = sig[:, 3 * hidden:4 * hidden]
    g_g = jnp.tanh(gates[:, 2 * hidden:3 * hidden])
    c_new = f_g * c_prev + i_g * g_g
    h_new = o_g * jnp.tanh(c_new)
    return h_new, c_new


# ----------------------------------------------------------------------------
# Kernel 1: reduced char BiLSTM + fused c_out Linear + ReLU.
#   gxf_ref : (T, B, 4H)  precomputed x@W_ih_fwd + b_fwd for every step
#   whhf_ref: (H, 4H)     forward recurrent weights
#   gxb_ref : (B, 4H)     precomputed x[T-1]@W_ih_bwd + b_bwd (only step needed)
#   wc1/wc2 : (H, n_fac)  c_out weight split (fwd half / bwd half)
#   bc_ref  : (1, n_fac)
#   out_ref : (B, n_fac)  relu(c_out(char_lstm_out[-1]))
# ----------------------------------------------------------------------------

def _char_bilstm_kernel(gxf_ref, whhf_ref, gxb_ref, wc1_ref, wc2_ref, bc_ref,
                        out_ref):
    T, B, _ = gxf_ref.shape
    H = whhf_ref.shape[0]
    whh_f = whhf_ref[...]                             # load once, reused each step

    # Forward recurrence, fully unrolled (T is small & static); only final h used.
    h = jnp.zeros((B, H), jnp.float32)
    c = jnp.zeros((B, H), jnp.float32)
    for t in range(T):
        gates = gxf_ref[t] + jnp.dot(h, whh_f, preferred_element_type=jnp.float32)
        h, c = _lstm_cell(gates, c, H)
    h_fwd_last = h

    # Backward direction's output at index T-1 is its FIRST step with zero state:
    # the recurrent matmul contributes nothing, so gates == gxb.
    h_bwd_last, _ = _lstm_cell(gxb_ref[...], jnp.zeros((B, H), jnp.float32), H)

    # Fused c_out Linear + ReLU (split weight avoids concatenating fwd/bwd).
    y = (jnp.dot(h_fwd_last, wc1_ref[...], preferred_element_type=jnp.float32)
         + jnp.dot(h_bwd_last, wc2_ref[...], preferred_element_type=jnp.float32)
         + bc_ref[...])
    out_ref[...] = jnp.maximum(y, 0.0).astype(out_ref.dtype)


def char_bilstm_reduced(gx_f, whh_f, gx_b_last, wc1, wc2, bc):
    _, B, _ = gx_f.shape
    n_out = wc1.shape[1]
    return pl.pallas_call(
        _char_bilstm_kernel,
        out_shape=jax.ShapeDtypeStruct((B, n_out), jnp.float32),
    )(gx_f, whh_f, gx_b_last, wc1, wc2, bc)


# ----------------------------------------------------------------------------
# Kernel 2: word BiLSTM + fused classifier Linear + log_softmax.
#   gxf_ref / gxb_ref : (T, B, 4H)  time-major hoisted input projections
#   whhf_ref/whhb_ref : (H, 4H)
#   w1/w2             : (H, n_classes)  classifier weight split (fwd / bwd half)
#   bo_ref            : (1, n_classes)
#   out_ref           : (T, B, n_classes) log-probabilities (time-major)
#   yf_ref (scratch)  : (T, B, H)    forward hidden states kept in VMEM
# ----------------------------------------------------------------------------

def _word_bilstm_kernel(gxf_ref, gxb_ref, whhf_ref, whhb_ref,
                        w1_ref, w2_ref, bo_ref, out_ref, yf_ref):
    T, B, _ = gxf_ref.shape
    H = whhf_ref.shape[0]
    whh_f = whhf_ref[...]
    whh_b = whhb_ref[...]
    w1 = w1_ref[...]
    w2 = w2_ref[...]
    bo = bo_ref[...]

    # Forward direction: stash per-step hidden states in VMEM scratch.
    h = jnp.zeros((B, H), jnp.float32)
    c = jnp.zeros((B, H), jnp.float32)
    for t in range(T):
        gates = gxf_ref[t] + jnp.dot(h, whh_f, preferred_element_type=jnp.float32)
        h, c = _lstm_cell(gates, c, H)
        yf_ref[t] = h

    # Backward direction (reversed indexing, no reversed copies) with the
    # classifier + log_softmax fused into each step's epilogue.
    h = jnp.zeros((B, H), jnp.float32)
    c = jnp.zeros((B, H), jnp.float32)
    for i in range(T):
        t = T - 1 - i
        gates = gxb_ref[t] + jnp.dot(h, whh_b, preferred_element_type=jnp.float32)
        h, c = _lstm_cell(gates, c, H)
        logits = (jnp.dot(yf_ref[t], w1, preferred_element_type=jnp.float32)
                  + jnp.dot(h, w2, preferred_element_type=jnp.float32)
                  + bo)
        m = jnp.max(logits, axis=-1, keepdims=True)
        s = logits - m
        lse = jnp.log(jnp.sum(jnp.exp(s), axis=-1, keepdims=True))
        out_ref[t] = (s - lse).astype(out_ref.dtype)


def word_bilstm_classifier(gx_f, gx_b, whh_f, whh_b, w1, w2, bo):
    T, B, _ = gx_f.shape
    H = whh_f.shape[0]
    n_classes = w1.shape[1]
    return pl.pallas_call(
        _word_bilstm_kernel,
        out_shape=jax.ShapeDtypeStruct((T, B, n_classes), jnp.float32),
        scratch_shapes=[pltpu.VMEM((T, B, H), jnp.float32)],
    )(gx_f, gx_b, whh_f, whh_b, w1, w2, bo)


# ----------------------------------------------------------------------------
# Parameter construction (deterministic, PyTorch-style uniform init)
# ----------------------------------------------------------------------------

def _uniform(key, shape, scale):
    return jax.random.uniform(key, shape, jnp.float32, -scale, scale)


def make_lstm_params(key, input_dim, hidden):
    """nn.LSTM-style params for one direction, pre-transposed for the kernels."""
    k1, k2, k3, k4 = jax.random.split(key, 4)
    s = 1.0 / float(hidden) ** 0.5
    w_ih = _uniform(k1, (4 * hidden, input_dim), s)   # PyTorch layout
    w_hh = _uniform(k2, (4 * hidden, hidden), s)
    b_ih = _uniform(k3, (4 * hidden,), s)
    b_hh = _uniform(k4, (4 * hidden,), s)
    return {"wih_t": jnp.transpose(w_ih),             # (input_dim, 4H)
            "whh_t": jnp.transpose(w_hh),             # (H, 4H)
            "b": b_ih + b_hh}                         # (4H,) combined bias


def make_params(key, vocab_size, char_size, n_fac, hidden_char, hidden_dim,
                n_classes):
    ks = jax.random.split(key, 10)
    sc = 1.0 / float(2 * hidden_char) ** 0.5
    so = 1.0 / float(2 * hidden_dim) ** 0.5
    return {
        "word_embed": jax.random.normal(ks[0], (vocab_size, n_fac), jnp.float32),
        "char_embed": jax.random.normal(ks[1], (char_size, n_fac), jnp.float32),
        "char_lstm_f": make_lstm_params(ks[2], n_fac, hidden_char),
        "char_lstm_b": make_lstm_params(ks[3], n_fac, hidden_char),
        "c_out_w_t": jnp.transpose(_uniform(ks[4], (n_fac, 2 * hidden_char), sc)),
        "c_out_b": _uniform(ks[5], (1, n_fac), sc),
        "word_lstm_f": make_lstm_params(ks[6], 2 * n_fac, hidden_dim),
        "word_lstm_b": make_lstm_params(ks[7], 2 * n_fac, hidden_dim),
        "out_w_t": jnp.transpose(_uniform(ks[8], (n_classes, 2 * hidden_dim), so)),
        "out_b": _uniform(ks[9], (1, n_classes), so),
    }


# ----------------------------------------------------------------------------
# Forward pass (mirrors lstm.forward)
# ----------------------------------------------------------------------------

@jax.jit
def lstm_forward(params, cs, char_sent):
    bs, seq_len = cs.shape
    n_fac = params["word_embed"].shape[1]

    # Embedding lookups (gathers) stay in XLA glue.
    char_x = params["char_embed"][char_sent]          # (MWL, bs*seq, n_fac)
    word_x = params["word_embed"][cs]                 # (bs, seq, n_fac)

    # ---------------- char path ----------------
    pf = params["char_lstm_f"]
    pb = params["char_lstm_b"]
    hc = pf["whh_t"].shape[0]
    # Hoisted input projections: one batched matmul for the forward direction and
    # only the single (last-step) row of the backward direction.
    gx_cf = jnp.einsum("tbd,dh->tbh", char_x, pf["wih_t"]) + pf["b"]
    gx_cb_last = jnp.dot(char_x[-1], pb["wih_t"]) + pb["b"]
    wc_t = params["c_out_w_t"]                        # (2*hc, n_fac)
    char_embeded = char_bilstm_reduced(
        gx_cf, pf["whh_t"], gx_cb_last,
        wc_t[:hc], wc_t[hc:], params["c_out_b"])      # (bs*seq, n_fac)
    char_embeded = char_embeded.reshape(bs, seq_len, n_fac)

    # ---------------- word path ----------------
    wf = params["word_lstm_f"]
    wb = params["word_lstm_b"]
    hd = wf["whh_t"].shape[0]

    def word_gx(p):
        # torch.cat((word_embed, char_embeded), dim=2) @ W_ih.T folded into two
        # matmuls against the split W_ih (no concat materialized); emitted
        # directly time-major so no activation transpose is needed.
        wih = p["wih_t"]                              # (2*n_fac, 4*hd)
        return (jnp.einsum("bsd,dh->sbh", word_x, wih[:n_fac])
                + jnp.einsum("bsd,dh->sbh", char_embeded, wih[n_fac:])
                + p["b"])                             # (seq, bs, 4*hd)

    wo_t = params["out_w_t"]                          # (2*hd, n_classes)
    logp_tm = word_bilstm_classifier(
        word_gx(wf), word_gx(wb), wf["whh_t"], wb["whh_t"],
        wo_t[:hd], wo_t[hd:], params["out_b"])        # (seq, bs, n_classes)
    return jnp.transpose(logp_tm, (1, 0, 2))          # (bs, seq, n_classes)


# ----------------------------------------------------------------------------
# Main
# ----------------------------------------------------------------------------

if __name__ == "__main__":
    # Small, deterministic shapes consistent with the module's forward.
    bs = 2
    seq_len = 4
    max_word_len = 6
    vocab_size = 50
    char_size = 30
    n_fac = 64          # scaled down from 512
    hidden_char = 32    # scaled down from 128
    hidden_dim = 32
    n_classes = 2

    root = jax.random.PRNGKey(0)
    k_params, k_cs, k_chars = jax.random.split(root, 3)

    params = make_params(k_params, vocab_size, char_size, n_fac,
                         hidden_char, hidden_dim, n_classes)

    cs = jax.random.randint(k_cs, (bs, seq_len), 0, vocab_size, jnp.int32)
    char_sent = jax.random.randint(k_chars, (max_word_len, bs * seq_len),
                                   0, char_size, jnp.int32)

    out = jax.block_until_ready(lstm_forward(params, cs, char_sent))

    assert out.shape == (bs, seq_len, n_classes)
    # log_softmax rows should sum (in prob space) to ~1 and be finite.
    assert jnp.allclose(jnp.sum(jnp.exp(out), axis=-1), 1.0, atol=1e-4)
    assert bool(jnp.all(jnp.isfinite(out)))

    print("KERNEL_OK")
</pallas_src>

<mosaic_0001>
module attributes {stable_mosaic.version = 11 : i64} {
  func.func @_char_bilstm_kernel(%arg0: memref<6x8x128xf32, #tpu.memory_space<vmem>>, %arg1: memref<32x128xf32, #tpu.memory_space<vmem>>, %arg2: memref<8x128xf32, #tpu.memory_space<vmem>>, %arg3: memref<32x64xf32, #tpu.memory_space<vmem>>, %arg4: memref<32x64xf32, #tpu.memory_space<vmem>>, %arg5: memref<1x64xf32, #tpu.memory_space<vmem>>, %arg6: memref<8x64xf32, #tpu.memory_space<vmem>>) attributes {dimension_semantics = [], scalar_prefetch = 0 : i64, scratch_operands = 0 : i64, tpu.core_type = #tpu.core_type<tc>} {
    %c0 = arith.constant 0 : index
    %c0_0 = arith.constant 0 : index
    %0 = vector.load %arg1[%c0, %c0_0] : memref<32x128xf32, #tpu.memory_space<vmem>>, vector<32x128xf32>
    %cst = arith.constant 0.000000e+00 : f32
    %1 = vector.broadcast %cst : f32 to vector<8x32xf32>
    %cst_1 = arith.constant 0.000000e+00 : f32
    %2 = vector.broadcast %cst_1 : f32 to vector<8x32xf32>
    %c0_2 = arith.constant 0 : index
    %c0_3 = arith.constant 0 : index
    %c0_4 = arith.constant 0 : index
    %3 = vector.load %arg0[%c0_2, %c0_3, %c0_4] : memref<6x8x128xf32, #tpu.memory_space<vmem>>, vector<1x8x128xf32>
    %4 = vector.shape_cast %3 : vector<1x8x128xf32> to vector<8x128xf32>
    %cst_5 = arith.constant dense<0.000000e+00> : vector<8x128xf32>
    %5 = tpu.matmul %1, %0, %cst_5 {dimension_numbers = #tpu.dot_dimension_numbers<[1], [0], [0], [1], [0, 0, 1, 1], [], []>} : vector<8x32xf32>, vector<32x128xf32>, vector<8x128xf32> -> vector<8x128xf32>
    %6 = arith.addf %4, %5 : vector<8x128xf32>
    %7 = arith.negf %6 : vector<8x128xf32>
    %8 = math.exp %7 : vector<8x128xf32>
    %cst_6 = arith.constant 1.000000e+00 : f32
    %9 = vector.broadcast %cst_6 : f32 to vector<8x128xf32>
    %10 = arith.addf %9, %8 : vector<8x128xf32>
    %11 = arith.divf %9, %10 : vector<8x128xf32>
    %12 = vector.extract_strided_slice %11 {offsets = [0, 0], sizes = [8, 32], strides = [1, 1]} : vector<8x128xf32> to vector<8x32xf32>
    %13 = vector.extract_strided_slice %11 {offsets = [0, 32], sizes = [8, 32], strides = [1, 1]} : vector<8x128xf32> to vector<8x32xf32>
    %14 = vector.extract_strided_slice %11 {offsets = [0, 96], sizes = [8, 32], strides = [1, 1]} : vector<8x128xf32> to vector<8x32xf32>
    %15 = vector.extract_strided_slice %6 {offsets = [0, 64], sizes = [8, 32], strides = [1, 1]} : vector<8x128xf32> to vector<8x32xf32>
    %16 = math.tanh %15 : vector<8x32xf32>
    %17 = arith.mulf %13, %2 : vector<8x32xf32>
    %18 = arith.mulf %12, %16 : vector<8x32xf32>
    %19 = arith.addf %17, %18 : vector<8x32xf32>
    %20 = math.tanh %19 : vector<8x32xf32>
    %21 = arith.mulf %14, %20 : vector<8x32xf32>
    %c1 = arith.constant 1 : index
    %c0_7 = arith.constant 0 : index
    %c0_8 = arith.constant 0 : index
    %22 = vector.load %arg0[%c1, %c0_7, %c0_8] : memref<6x8x128xf32, #tpu.memory_space<vmem>>, vector<1x8x128xf32>
    %23 = vector.shape_cast %22 : vector<1x8x128xf32> to vector<8x128xf32>
    %cst_9 = arith.constant dense<0.000000e+00> : vector<8x128xf32>
    %24 = tpu.matmul %21, %0, %cst_9 {dimension_numbers = #tpu.dot_dimension_numbers<[1], [0], [0], [1], [0, 0, 1, 1], [], []>} : vector<8x32xf32>, vector<32x128xf32>, vector<8x128xf32> -> vector<8x128xf32>
    %25 = arith.addf %23, %24 : vector<8x128xf32>
    %26 = arith.negf %25 : vector<8x128xf32>
    %27 = math.exp %26 : vector<8x128xf32>
    %cst_10 = arith.constant 1.000000e+00 : f32
    %28 = vector.broadcast %cst_10 : f32 to vector<8x128xf32>
    %29 = arith.addf %28, %27 : vector<8x128xf32>
    %30 = arith.divf %28, %29 : vector<8x128xf32>
    %31 = vector.extract_strided_slice %30 {offsets = [0, 0], sizes = [8, 32], strides = [1, 1]} : vector<8x128xf32> to vector<8x32xf32>
    %32 = vector.extract_strided_slice %30 {offsets = [0, 32], sizes = [8, 32], strides = [1, 1]} : vector<8x128xf32> to vector<8x32xf32>
    %33 = vector.extract_strided_slice %30 {offsets = [0, 96], sizes = [8, 32], strides = [1, 1]} : vector<8x128xf32> to vector<8x32xf32>
    %34 = vector.extract_strided_slice %25 {offsets = [0, 64], sizes = [8, 32], strides = [1, 1]} : vector<8x128xf32> to vector<8x32xf32>
    %35 = math.tanh %34 : vector<8x32xf32>
    %36 = arith.mulf %32, %19 : vector<8x32xf32>
    %37 = arith.mulf %31, %35 : vector<8x32xf32>
    %38 = arith.addf %36, %37 : vector<8x32xf32>
    %39 = math.tanh %38 : vector<8x32xf32>
    %40 = arith.mulf %33, %39 : vector<8x32xf32>
    %c2 = arith.constant 2 : index
    %c0_11 = arith.constant 0 : index
    %c0_12 = arith.constant 0 : index
    %41 = vector.load %arg0[%c2, %c0_11, %c0_12] : memref<6x8x128xf32, #tpu.memory_space<vmem>>, vector<1x8x128xf32>
    %42 = vector.shape_cast %41 : vector<1x8x128xf32> to vector<8x128xf32>
    %cst_13 = arith.constant dense<0.000000e+00> : vector<8x128xf32>
    %43 = tpu.matmul %40, %0, %cst_13 {dimension_numbers = #tpu.dot_dimension_numbers<[1], [0], [0], [1], [0, 0, 1, 1], [], []>} : vector<8x32xf32>, vector<32x128xf32>, vector<8x128xf32> -> vector<8x128xf32>
    %44 = arith.addf %42, %43 : vector<8x128xf32>
    %45 = arith.negf %44 : vector<8x128xf32>
    %46 = math.exp %45 : vector<8x128xf32>
    %cst_14 = arith.constant 1.000000e+00 : f32
    %47 = vector.broadcast %cst_14 : f32 to vector<8x128xf32>
    %48 = arith.addf %47, %46 : vector<8x128xf32>
    %49 = arith.divf %47, %48 : vector<8x128xf32>
    %50 = vector.extract_strided_slice %49 {offsets = [0, 0], sizes = [8, 32], strides = [1, 1]} : vector<8x128xf32> to vector<8x32xf32>
    %51 = vector.extract_strided_slice %49 {offsets = [0, 32], sizes = [8, 32], strides = [1, 1]} : vector<8x128xf32> to vector<8x32xf32>
    %52 = vector.extract_strided_slice %49 {offsets = [0, 96], sizes = [8, 32], strides = [1, 1]} : vector<8x128xf32> to vector<8x32xf32>
    %53 = vector.extract_strided_slice %44 {offsets = [0, 64], sizes = [8, 32], strides = [1, 1]} : vector<8x128xf32> to vector<8x32xf32>
    %54 = math.tanh %53 : vector<8x32xf32>
    %55 = arith.mulf %51, %38 : vector<8x32xf32>
    %56 = arith.mulf %50, %54 : vector<8x32xf32>
    %57 = arith.addf %55, %56 : vector<8x32xf32>
    %58 = math.tanh %57 : vector<8x32xf32>
    %59 = arith.mulf %52, %58 : vector<8x32xf32>
    %c3 = arith.constant 3 : index
    %c0_15 = arith.constant 0 : index
    %c0_16 = arith.constant 0 : index
    %60 = vector.load %arg0[%c3, %c0_15, %c0_16] : memref<6x8x128xf32, #tpu.memory_space<vmem>>, vector<1x8x128xf32>
    %61 = vector.shape_cast %60 : vector<1x8x128xf32> to vector<8x128xf32>
    %cst_17 = arith.constant dense<0.000000e+00> : vector<8x128xf32>
    %62 = tpu.matmul %59, %0, %cst_17 {dimension_numbers = #tpu.dot_dimension_numbers<[1], [0], [0], [1], [0, 0, 1, 1], [], []>} : vector<8x32xf32>, vector<32x128xf32>, vector<8x128xf32> -> vector<8x128xf32>
    %63 = arith.addf %61, %62 : vector<8x128xf32>
    %64 = arith.negf %63 : vector<8x128xf32>
    %65 = math.exp %64 : vector<8x128xf32>
    %cst_18 = arith.constant 1.000000e+00 : f32
    %66 = vector.broadcast %cst_18 : f32 to vector<8x128xf32>
    %67 = arith.addf %66, %65 : vector<8x128xf32>
    %68 = arith.divf %66, %67 : vector<8x128xf32>
    %69 = vector.extract_strided_slice %68 {offsets = [0, 0], sizes = [8, 32], strides = [1, 1]} : vector<8x128xf32> to vector<8x32xf32>
    %70 = vector.extract_strided_slice %68 {offsets = [0, 32], sizes = [8, 32], strides = [1, 1]} : vector<8x128xf32> to vector<8x32xf32>
    %71 = vector.extract_strided_slice %68 {offsets = [0, 96], sizes = [8, 32], strides = [1, 1]} : vector<8x128xf32> to vector<8x32xf32>
    %72 = vector.extract_strided_slice %63 {offsets = [0, 64], sizes = [8, 32], strides = [1, 1]} : vector<8x128xf32> to vector<8x32xf32>
    %73 = math.tanh %72 : vector<8x32xf32>
    %74 = arith.mulf %70, %57 : vector<8x32xf32>
    %75 = arith.mulf %69, %73 : vector<8x32xf32>
    %76 = arith.addf %74, %75 : vector<8x32xf32>
    %77 = math.tanh %76 : vector<8x32xf32>
    %78 = arith.mulf %71, %77 : vector<8x32xf32>
    %c4 = arith.constant 4 : index
    %c0_19 = arith.constant 0 : index
    %c0_20 = arith.constant 0 : index
    %79 = vector.load %arg0[%c4, %c0_19, %c0_20] : memref<6x8x128xf32, #tpu.memory_space<vmem>>, vector<1x8x128xf32>
    %80 = vector.shape_cast %79 : vector<1x8x128xf32> to vector<8x128xf32>
    %cst_21 = arith.constant dense<0.000000e+00> : vector<8x128xf32>
    %81 = tpu.matmul %78, %0, %cst_21 {dimension_numbers = #tpu.dot_dimension_numbers<[1], [0], [0], [1], [0, 0, 1, 1], [], []>} : vector<8x32xf32>, vector<32x128xf32>, vector<8x128xf32> -> vector<8x128xf32>
    %82 = arith.addf %80, %81 : vector<8x128xf32>
    %83 = arith.negf %82 : vector<8x128xf32>
    %84 = math.exp %83 : vector<8x128xf32>
    %cst_22 = arith.constant 1.000000e+00 : f32
    %85 = vector.broadcast %cst_22 : f32 to vector<8x128xf32>
    %86 = arith.addf %85, %84 : vector<8x128xf32>
    %87 = arith.divf %85, %86 : vector<8x128xf32>
    %88 = vector.extract_strided_slice %87 {offsets = [0, 0], sizes = [8, 32], strides = [1, 1]} : vector<8x128xf32> to vector<8x32xf32>
    %89 = vector.extract_strided_slice %87 {offsets = [0, 32], sizes = [8, 32], strides = [1, 1]} : vector<8x128xf32> to vector<8x32xf32>
    %90 = vector.extract_strided_slice %87 {offsets = [0, 96], sizes = [8, 32], strides = [1, 1]} : vector<8x128xf32> to vector<8x32xf32>
    %91 = vector.extract_strided_slice %82 {offsets = [0, 64], sizes = [8, 32], strides = [1, 1]} : vector<8x128xf32> to vector<8x32xf32>
    %92 = math.tanh %91 : vector<8x32xf32>
    %93 = arith.mulf %89, %76 : vector<8x32xf32>
    %94 = arith.mulf %88, %92 : vector<8x32xf32>
    %95 = arith.addf %93, %94 : vector<8x32xf32>
    %96 = math.tanh %95 : vector<8x32xf32>
    %97 = arith.mulf %90, %96 : vector<8x32xf32>
    %c5 = arith.constant 5 : index
    %c0_23 = arith.constant 0 : index
    %c0_24 = arith.constant 0 : index
    %98 = vector.load %arg0[%c5, %c0_23, %c0_24] : memref<6x8x128xf32, #tpu.memory_space<vmem>>, vector<1x8x128xf32>
    %99 = vector.shape_cast %98 : vector<1x8x128xf32> to vector<8x128xf32>
    %cst_25 = arith.constant dense<0.000000e+00> : vector<8x128xf32>
    %100 = tpu.matmul %97, %0, %cst_25 {dimension_numbers = #tpu.dot_dimension_numbers<[1], [0], [0], [1], [0, 0, 1, 1], [], []>} : vector<8x32xf32>, vector<32x128xf32>, vector<8x128xf32> -> vector<8x128xf32>
    %101 = arith.addf %99, %100 : vector<8x128xf32>
    %102 = arith.negf %101 : vector<8x128xf32>
    %103 = math.exp %102 : vector<8x128xf32>
    %cst_26 = arith.constant 1.000000e+00 : f32
    %104 = vector.broadcast %cst_26 : f32 to vector<8x128xf32>
    %105 = arith.addf %104, %103 : vector<8x128xf32>
    %106 = arith.divf %104, %105 : vector<8x128xf32>
    %107 = vector.extract_strided_slice %106 {offsets = [0, 0], sizes = [8, 32], strides = [1, 1]} : vector<8x128xf32> to vector<8x32xf32>
    %108 = vector.extract_strided_slice %106 {offsets = [0, 32], sizes = [8, 32], strides = [1, 1]} : vector<8x128xf32> to vector<8x32xf32>
    %109 = vector.extract_strided_slice %106 {offsets = [0, 96], sizes = [8, 32], strides = [1, 1]} : vector<8x128xf32> to vector<8x32xf32>
    %110 = vector.extract_strided_slice %101 {offsets = [0, 64], sizes = [8, 32], strides = [1, 1]} : vector<8x128xf32> to vector<8x32xf32>
    %111 = math.tanh %110 : vector<8x32xf32>
    %112 = arith.mulf %108, %95 : vector<8x32xf32>
    %113 = arith.mulf %107, %111 : vector<8x32xf32>
    %114 = arith.addf %112, %113 : vector<8x32xf32>
    %115 = math.tanh %114 : vector<8x32xf32>
    %116 = arith.mulf %109, %115 : vector<8x32xf32>
    %c0_27 = arith.constant 0 : index
    %c0_28 = arith.constant 0 : index
    %117 = vector.load %arg2[%c0_27, %c0_28] : memref<8x128xf32, #tpu.memory_space<vmem>>, vector<8x128xf32>
    %cst_29 = arith.constant 0.000000e+00 : f32
    %118 = vector.broadcast %cst_29 : f32 to vector<8x32xf32>
    %119 = arith.negf %117 : vector<8x128xf32>
    %120 = math.exp %119 : vector<8x128xf32>
    %cst_30 = arith.constant 1.000000e+00 : f32
    %121 = vector.broadcast %cst_30 : f32 to vector<8x128xf32>
    %122 = arith.addf %121, %120 : vector<8x128xf32>
    %123 = arith.divf %121, %122 : vector<8x128xf32>
    %124 = vector.extract_strided_slice %123 {offsets = [0, 0], sizes = [8, 32], strides = [1, 1]} : vector<8x128xf32> to vector<8x32xf32>
    %125 = vector.extract_strided_slice %123 {offsets = [0, 32], sizes = [8, 32], strides = [1, 1]} : vector<8x128xf32> to vector<8x32xf32>
    %126 = vector.extract_strided_slice %123 {offsets = [0, 96], sizes = [8, 32], strides = [1, 1]} : vector<8x128xf32> to vector<8x32xf32>
    %127 = vector.extract_strided_slice %117 {offsets = [0, 64], sizes = [8, 32], strides = [1, 1]} : vector<8x128xf32> to vector<8x32xf32>
    %128 = math.tanh %127 : vector<8x32xf32>
    %129 = arith.mulf %125, %118 : vector<8x32xf32>
    %130 = arith.mulf %124, %128 : vector<8x32xf32>
    %131 = arith.addf %129, %130 : vector<8x32xf32>
    %132 = math.tanh %131 : vector<8x32xf32>
    %133 = arith.mulf %126, %132 : vector<8x32xf32>
    %c0_31 = arith.constant 0 : index
    %c0_32 = arith.constant 0 : index
    %134 = vector.load %arg3[%c0_31, %c0_32] : memref<32x64xf32, #tpu.memory_space<vmem>>, vector<32x64xf32>
    %cst_33 = arith.constant dense<0.000000e+00> : vector<8x64xf32>
    %135 = tpu.matmul %116, %134, %cst_33 {dimension_numbers = #tpu.dot_dimension_numbers<[1], [0], [0], [1], [0, 0, 1, 1], [], []>} : vector<8x32xf32>, vector<32x64xf32>, vector<8x64xf32> -> vector<8x64xf32>
    %c0_34 = arith.constant 0 : index
    %c0_35 = arith.constant 0 : index
    %136 = vector.load %arg4[%c0_34, %c0_35] : memref<32x64xf32, #tpu.memory_space<vmem>>, vector<32x64xf32>
    %cst_36 = arith.constant dense<0.000000e+00> : vector<8x64xf32>
    %137 = tpu.matmul %133, %136, %cst_36 {dimension_numbers = #tpu.dot_dimension_numbers<[1], [0], [0], [1], [0, 0, 1, 1], [], []>} : vector<8x32xf32>, vector<32x64xf32>, vector<8x64xf32> -> vector<8x64xf32>
    %138 = arith.addf %135, %137 : vector<8x64xf32>
    %c0_37 = arith.constant 0 : index
    %c0_38 = arith.constant 0 : index
    %139 = vector.load %arg5[%c0_37, %c0_38] : memref<1x64xf32, #tpu.memory_space<vmem>>, vector<1x64xf32>
    %140 = vector.broadcast %139 : vector<1x64xf32> to vector<8x64xf32>
    %141 = arith.addf %138, %140 : vector<8x64xf32>
    %cst_39 = arith.constant 0.000000e+00 : f32
    %142 = vector.broadcast %cst_39 : f32 to vector<8x64xf32>
    %143 = arith.maximumf %141, %142 : vector<8x64xf32>
    %c0_40 = arith.constant 0 : index
    %c0_41 = arith.constant 0 : index
    %144 = vector.load %arg6[%c0_40, %c0_41] : memref<8x64xf32, #tpu.memory_space<vmem>>, vector<8x64xf32>
    tpu.vector_store %arg6[%c0_40, %c0_41], %143 {strides = array<i32>} : memref<8x64xf32, #tpu.memory_space<vmem>>, vector<8x64xf32>,
    return
  }
}

module attributes {stable_mosaic.version = 11 : i64} {
  func.func @_word_bilstm_kernel(%arg0: memref<4x2x128xf32, #tpu.memory_space<vmem>>, %arg1: memref<4x2x128xf32, #tpu.memory_space<vmem>>, %arg2: memref<32x128xf32, #tpu.memory_space<vmem>>, %arg3: memref<32x128xf32, #tpu.memory_space<vmem>>, %arg4: memref<32x2xf32, #tpu.memory_space<vmem>>, %arg5: memref<32x2xf32, #tpu.memory_space<vmem>>, %arg6: memref<1x2xf32, #tpu.memory_space<vmem>>, %arg7: memref<4x2x2xf32, #tpu.memory_space<vmem>>, %arg8: memref<4x2x32xf32, #tpu.memory_space<vmem>>) attributes {dimension_semantics = [], scalar_prefetch = 0 : i64, scratch_operands = 1 : i64, tpu.core_type = #tpu.core_type<tc>} {
    %c0 = arith.constant 0 : index
    %c0_0 = arith.constant 0 : index
    %0 = vector.load %arg2[%c0, %c0_0] : memref<32x128xf32, #tpu.memory_space<vmem>>, vector<32x128xf32>
    %c0_1 = arith.constant 0 : index
    %c0_2 = arith.constant 0 : index
    %1 = vector.load %arg3[%c0_1, %c0_2] : memref<32x128xf32, #tpu.memory_space<vmem>>, vector<32x128xf32>
    %c0_3 = arith.constant 0 : index
    %c0_4 = arith.constant 0 : index
    %2 = vector.load %arg4[%c0_3, %c0_4] : memref<32x2xf32, #tpu.memory_space<vmem>>, vector<32x2xf32>
    %c0_5 = arith.constant 0 : index
    %c0_6 = arith.constant 0 : index
    %3 = vector.load %arg5[%c0_5, %c0_6] : memref<32x2xf32, #tpu.memory_space<vmem>>, vector<32x2xf32>
    %c0_7 = arith.constant 0 : index
    %c0_8 = arith.constant 0 : index
    %4 = vector.load %arg6[%c0_7, %c0_8] : memref<1x2xf32, #tpu.memory_space<vmem>>, vector<1x2xf32>
    %cst = arith.constant 0.000000e+00 : f32
    %5 = vector.broadcast %cst : f32 to vector<2x32xf32>
    %cst_9 = arith.constant 0.000000e+00 : f32
    %6 = vector.broadcast %cst_9 : f32 to vector<2x32xf32>
    %c0_10 = arith.constant 0 : index
    %c0_11 = arith.constant 0 : index
    %c0_12 = arith.constant 0 : index
    %7 = vector.load %arg0[%c0_10, %c0_11, %c0_12] : memref<4x2x128xf32, #tpu.memory_space<vmem>>, vector<1x2x128xf32>
    %8 = vector.shape_cast %7 : vector<1x2x128xf32> to vector<2x128xf32>
    %cst_13 = arith.constant dense<0.000000e+00> : vector<2x128xf32>
    %9 = tpu.matmul %5, %0, %cst_13 {dimension_numbers = #tpu.dot_dimension_numbers<[1], [0], [0], [1], [0, 0, 1, 1], [], []>} : vector<2x32xf32>, vector<32x128xf32>, vector<2x128xf32> -> vector<2x128xf32>
    %10 = arith.addf %8, %9 : vector<2x128xf32>
    %11 = arith.negf %10 : vector<2x128xf32>
    %12 = math.exp %11 : vector<2x128xf32>
    %cst_14 = arith.constant 1.000000e+00 : f32
    %13 = vector.broadcast %cst_14 : f32 to vector<2x128xf32>
    %14 = arith.addf %13, %12 : vector<2x128xf32>
    %15 = arith.divf %13, %14 : vector<2x128xf32>
    %16 = vector.extract_strided_slice %15 {offsets = [0, 0], sizes = [2, 32], strides = [1, 1]} : vector<2x128xf32> to vector<2x32xf32>
    %17 = vector.extract_strided_slice %15 {offsets = [0, 32], sizes = [2, 32], strides = [1, 1]} : vector<2x128xf32> to vector<2x32xf32>
    %18 = vector.extract_strided_slice %15 {offsets = [0, 96], sizes = [2, 32], strides = [1, 1]} : vector<2x128xf32> to vector<2x32xf32>
    %19 = vector.extract_strided_slice %10 {offsets = [0, 64], sizes = [2, 32], strides = [1, 1]} : vector<2x128xf32> to vector<2x32xf32>
    %20 = math.tanh %19 : vector<2x32xf32>
    %21 = arith.mulf %17, %6 : vector<2x32xf32>
    %22 = arith.mulf %16, %20 : vector<2x32xf32>
    %23 = arith.addf %21, %22 : vector<2x32xf32>
    %24 = math.tanh %23 : vector<2x32xf32>
    %25 = arith.mulf %18, %24 : vector<2x32xf32>
    %c0_15 = arith.constant 0 : index
    %c0_16 = arith.constant 0 : index
    %c0_17 = arith.constant 0 : index
    %26 = vector.load %arg8[%c0_15, %c0_16, %c0_17] : memref<4x2x32xf32, #tpu.memory_space<vmem>>, vector<1x2x32xf32>
    %27 = vector.shape_cast %26 : vector<1x2x32xf32> to vector<2x32xf32>
    %28 = vector.shape_cast %25 : vector<2x32xf32> to vector<1x2x32xf32>
    tpu.vector_store %arg8[%c0_15, %c0_16, %c0_17], %28 {strides = array<i32>} : memref<4x2x32xf32, #tpu.memory_space<vmem>>, vector<1x2x32xf32>,
    %c1 = arith.constant 1 : index
    %c0_18 = arith.constant 0 : index
    %c0_19 = arith.constant 0 : index
    %29 = vector.load %arg0[%c1, %c0_18, %c0_19] : memref<4x2x128xf32, #tpu.memory_space<vmem>>, vector<1x2x128xf32>
    %30 = vector.shape_cast %29 : vector<1x2x128xf32> to vector<2x128xf32>
    %cst_20 = arith.constant dense<0.000000e+00> : vector<2x128xf32>
    %31 = tpu.matmul %25, %0, %cst_20 {dimension_numbers = #tpu.dot_dimension_numbers<[1], [0], [0], [1], [0, 0, 1, 1], [], []>} : vector<2x32xf32>, vector<32x128xf32>, vector<2x128xf32> -> vector<2x128xf32>
    %32 = arith.addf %30, %31 : vector<2x128xf32>
    %33 = arith.negf %32 : vector<2x128xf32>
    %34 = math.exp %33 : vector<2x128xf32>
    %cst_21 = arith.constant 1.000000e+00 : f32
    %35 = vector.broadcast %cst_21 : f32 to vector<2x128xf32>
    %36 = arith.addf %35, %34 : vector<2x128xf32>
    %37 = arith.divf %35, %36 : vector<2x128xf32>
    %38 = vector.extract_strided_slice %37 {offsets = [0, 0], sizes = [2, 32], strides = [1, 1]} : vector<2x128xf32> to vector<2x32xf32>
    %39 = vector.extract_strided_slice %37 {offsets = [0, 32], sizes = [2, 32], strides = [1, 1]} : vector<2x128xf32> to vector<2x32xf32>
    %40 = vector.extract_strided_slice %37 {offsets = [0, 96], sizes = [2, 32], strides = [1, 1]} : vector<2x128xf32> to vector<2x32xf32>
    %41 = vector.extract_strided_slice %32 {offsets = [0, 64], sizes = [2, 32], strides = [1, 1]} : vector<2x128xf32> to vector<2x32xf32>
    %42 = math.tanh %41 : vector<2x32xf32>
    %43 = arith.mulf %39, %23 : vector<2x32xf32>
    %44 = arith.mulf %38, %42 : vector<2x32xf32>
    %45 = arith.addf %43, %44 : vector<2x32xf32>
    %46 = math.tanh %45 : vector<2x32xf32>
    %47 = arith.mulf %40, %46 : vector<2x32xf32>
    %c1_22 = arith.constant 1 : index
    %c0_23 = arith.constant 0 : index
    %c0_24 = arith.constant 0 : index
    %48 = vector.load %arg8[%c1_22, %c0_23, %c0_24] : memref<4x2x32xf32, #tpu.memory_space<vmem>>, vector<1x2x32xf32>
    %49 = vector.shape_cast %48 : vector<1x2x32xf32> to vector<2x32xf32>
    %50 = vector.shape_cast %47 : vector<2x32xf32> to vector<1x2x32xf32>
    tpu.vector_store %arg8[%c1_22, %c0_23, %c0_24], %50 {strides = array<i32>} : memref<4x2x32xf32, #tpu.memory_space<vmem>>, vector<1x2x32xf32>,
    %c2 = arith.constant 2 : index
    %c0_25 = arith.constant 0 : index
    %c0_26 = arith.constant 0 : index
    %51 = vector.load %arg0[%c2, %c0_25, %c0_26] : memref<4x2x128xf32, #tpu.memory_space<vmem>>, vector<1x2x128xf32>
    %52 = vector.shape_cast %51 : vector<1x2x128xf32> to vector<2x128xf32>
    %cst_27 = arith.constant dense<0.000000e+00> : vector<2x128xf32>
    %53 = tpu.matmul %47, %0, %cst_27 {dimension_numbers = #tpu.dot_dimension_numbers<[1], [0], [0], [1], [0, 0, 1, 1], [], []>} : vector<2x32xf32>, vector<32x128xf32>, vector<2x128xf32> -> vector<2x128xf32>
    %54 = arith.addf %52, %53 : vector<2x128xf32>
    %55 = arith.negf %54 : vector<2x128xf32>
    %56 = math.exp %55 : vector<2x128xf32>
    %cst_28 = arith.constant 1.000000e+00 : f32
    %57 = vector.broadcast %cst_28 : f32 to vector<2x128xf32>
    %58 = arith.addf %57, %56 : vector<2x128xf32>
    %59 = arith.divf %57, %58 : vector<2x128xf32>
    %60 = vector.extract_strided_slice %59 {offsets = [0, 0], sizes = [2, 32], strides = [1, 1]} : vector<2x128xf32> to vector<2x32xf32>
    %61 = vector.extract_strided_slice %59 {offsets = [0, 32], sizes = [2, 32], strides = [1, 1]} : vector<2x128xf32> to vector<2x32xf32>
    %62 = vector.extract_strided_slice %59 {offsets = [0, 96], sizes = [2, 32], strides = [1, 1]} : vector<2x128xf32> to vector<2x32xf32>
    %63 = vector.extract_strided_slice %54 {offsets = [0, 64], sizes = [2, 32], strides = [1, 1]} : vector<2x128xf32> to vector<2x32xf32>
    %64 = math.tanh %63 : vector<2x32xf32>
    %65 = arith.mulf %61, %45 : vector<2x32xf32>
    %66 = arith.mulf %60, %64 : vector<2x32xf32>
    %67 = arith.addf %65, %66 : vector<2x32xf32>
    %68 = math.tanh %67 : vector<2x32xf32>
    %69 = arith.mulf %62, %68 : vector<2x32xf32>
    %c2_29 = arith.constant 2 : index
    %c0_30 = arith.constant 0 : index
    %c0_31 = arith.constant 0 : index
    %70 = vector.load %arg8[%c2_29, %c0_30, %c0_31] : memref<4x2x32xf32, #tpu.memory_space<vmem>>, vector<1x2x32xf32>
    %71 = vector.shape_cast %70 : vector<1x2x32xf32> to vector<2x32xf32>
    %72 = vector.shape_cast %69 : vector<2x32xf32> to vector<1x2x32xf32>
    tpu.vector_store %arg8[%c2_29, %c0_30, %c0_31], %72 {strides = array<i32>} : memref<4x2x32xf32, #tpu.memory_space<vmem>>, vector<1x2x32xf32>,
    %c3 = arith.constant 3 : index
    %c0_32 = arith.constant 0 : index
    %c0_33 = arith.constant 0 : index
    %73 = vector.load %arg0[%c3, %c0_32, %c0_33] : memref<4x2x128xf32, #tpu.memory_space<vmem>>, vector<1x2x128xf32>
    %74 = vector.shape_cast %73 : vector<1x2x128xf32> to vector<2x128xf32>
    %cst_34 = arith.constant dense<0.000000e+00> : vector<2x128xf32>
    %75 = tpu.matmul %69, %0, %cst_34 {dimension_numbers = #tpu.dot_dimension_numbers<[1], [0], [0], [1], [0, 0, 1, 1], [], []>} : vector<2x32xf32>, vector<32x128xf32>, vector<2x128xf32> -> vector<2x128xf32>
    %76 = arith.addf %74, %75 : vector<2x128xf32>
    %77 = arith.negf %76 : vector<2x128xf32>
    %78 = math.exp %77 : vector<2x128xf32>
    %cst_35 = arith.constant 1.000000e+00 : f32
    %79 = vector.broadcast %cst_35 : f32 to vector<2x128xf32>
    %80 = arith.addf %79, %78 : vector<2x128xf32>
    %81 = arith.divf %79, %80 : vector<2x128xf32>
    %82 = vector.extract_strided_slice %81 {offsets = [0, 0], sizes = [2, 32], strides = [1, 1]} : vector<2x128xf32> to vector<2x32xf32>
    %83 = vector.extract_strided_slice %81 {offsets = [0, 32], sizes = [2, 32], strides = [1, 1]} : vector<2x128xf32> to vector<2x32xf32>
    %84 = vector.extract_strided_slice %81 {offsets = [0, 96], sizes = [2, 32], strides = [1, 1]} : vector<2x128xf32> to vector<2x32xf32>
    %85 = vector.extract_strided_slice %76 {offsets = [0, 64], sizes = [2, 32], strides = [1, 1]} : vector<2x128xf32> to vector<2x32xf32>
    %86 = math.tanh %85 : vector<2x32xf32>
    %87 = arith.mulf %83, %67 : vector<2x32xf32>
    %88 = arith.mulf %82, %86 : vector<2x32xf32>
    %89 = arith.addf %87, %88 : vector<2x32xf32>
    %90 = math.tanh %89 : vector<2x32xf32>
    %91 = arith.mulf %84, %90 : vector<2x32xf32>
    %c3_36 = arith.constant 3 : index
    %c0_37 = arith.constant 0 : index
    %c0_38 = arith.constant 0 : index
    %92 = vector.load %arg8[%c3_36, %c0_37, %c0_38] : memref<4x2x32xf32, #tpu.memory_space<vmem>>, vector<1x2x32xf32>
    %93 = vector.shape_cast %92 : vector<1x2x32xf32> to vector<2x32xf32>
    %94 = vector.shape_cast %91 : vector<2x32xf32> to vector<1x2x32xf32>
    tpu.vector_store %arg8[%c3_36, %c0_37, %c0_38], %94 {strides = array<i32>} : memref<4x2x32xf32, #tpu.memory_space<vmem>>, vector<1x2x32xf32>,
    %cst_39 = arith.constant 0.000000e+00 : f32
    %95 = vector.broadcast %cst_39 : f32 to vector<2x32xf32>
    %cst_40 = arith.constant 0.000000e+00 : f32
    %96 = vector.broadcast %cst_40 : f32 to vector<2x32xf32>
    %c3_41 = arith.constant 3 : index
    %c0_42 = arith.constant 0 : index
    %c0_43 = arith.constant 0 : index
    %97 = vector.load %arg1[%c3_41, %c0_42, %c0_43] : memref<4x2x128xf32, #tpu.memory_space<vmem>>, vector<1x2x128xf32>
    %98 = vector.shape_cast %97 : vector<1x2x128xf32> to vector<2x128xf32>
    %cst_44 = arith.constant dense<0.000000e+00> : vector<2x128xf32>
    %99 = tpu.matmul %95, %1, %cst_44 {dimension_numbers = #tpu.dot_dimension_numbers<[1], [0], [0], [1], [0, 0, 1, 1], [], []>} : vector<2x32xf32>, vector<32x128xf32>, vector<2x128xf32> -> vector<2x128xf32>
    %100 = arith.addf %98, %99 : vector<2x128xf32>
    %101 = arith.negf %100 : vector<2x128xf32>
    %102 = math.exp %101 : vector<2x128xf32>
    %cst_45 = arith.constant 1.000000e+00 : f32
    %103 = vector.broadcast %cst_45 : f32 to vector<2x128xf32>
    %104 = arith.addf %103, %102 : vector<2x128xf32>
    %105 = arith.divf %103, %104 : vector<2x128xf32>
    %106 = vector.extract_strided_slice %105 {offsets = [0, 0], sizes = [2, 32], strides = [1, 1]} : vector<2x128xf32> to vector<2x32xf32>
    %107 = vector.extract_strided_slice %105 {offsets = [0, 32], sizes = [2, 32], strides = [1, 1]} : vector<2x128xf32> to vector<2x32xf32>
    %108 = vector.extract_strided_slice %105 {offsets = [0, 96], sizes = [2, 32], strides = [1, 1]} : vector<2x128xf32> to vector<2x32xf32>
    %109 = vector.extract_strided_slice %100 {offsets = [0, 64], sizes = [2, 32], strides = [1, 1]} : vector<2x128xf32> to vector<2x32xf32>
    %110 = math.tanh %109 : vector<2x32xf32>
    %111 = arith.mulf %107, %96 : vector<2x32xf32>
    %112 = arith.mulf %106, %110 : vector<2x32xf32>
    %113 = arith.addf %111, %112 : vector<2x32xf32>
    %114 = math.tanh %113 : vector<2x32xf32>
    %115 = arith.mulf %108, %114 : vector<2x32xf32>
    %c3_46 = arith.constant 3 : index
    %c0_47 = arith.constant 0 : index
    %c0_48 = arith.constant 0 : index
    %116 = vector.load %arg8[%c3_46, %c0_47, %c0_48] : memref<4x2x32xf32, #tpu.memory_space<vmem>>, vector<1x2x32xf32>
    %117 = vector.shape_cast %116 : vector<1x2x32xf32> to vector<2x32xf32>
    %cst_49 = arith.constant dense<0.000000e+00> : vector<2x2xf32>
    %118 = tpu.matmul %117, %2, %cst_49 {dimension_numbers = #tpu.dot_dimension_numbers<[1], [0], [0], [1], [0, 0, 1, 1], [], []>} : vector<2x32xf32>, vector<32x2xf32>, vector<2x2xf32> -> vector<2x2xf32>
    %cst_50 = arith.constant dense<0.000000e+00> : vector<2x2xf32>
    %119 = tpu.matmul %115, %3, %cst_50 {dimension_numbers = #tpu.dot_dimension_numbers<[1], [0], [0], [1], [0, 0, 1, 1], [], []>} : vector<2x32xf32>, vector<32x2xf32>, vector<2x2xf32> -> vector<2x2xf32>
    %120 = arith.addf %118, %119 : vector<2x2xf32>
    %121 = vector.broadcast %4 : vector<1x2xf32> to vector<2x2xf32>
    %122 = arith.addf %120, %121 : vector<2x2xf32>
    %cst_51 = arith.constant dense<0xFF800000> : vector<2xf32>
    %123 = vector.multi_reduction <maximumf>, %122, %cst_51 [1] : vector<2x2xf32> to vector<2xf32>
    %124 = vector.shape_cast %123 : vector<2xf32> to vector<2x1xf32>
    %125 = vector.broadcast %124 : vector<2x1xf32> to vector<2x2xf32>
    %126 = arith.subf %122, %125 : vector<2x2xf32>
    %127 = math.exp %126 : vector<2x2xf32>
    %cst_52 = arith.constant dense<0.000000e+00> : vector<2xf32>
    %128 = vector.multi_reduction <add>, %127, %cst_52 [1] : vector<2x2xf32> to vector<2xf32>
    %129 = vector.shape_cast %128 : vector<2xf32> to vector<2x1xf32>
    %130 = math.log %129 : vector<2x1xf32>
    %131 = vector.broadcast %130 : vector<2x1xf32> to vector<2x2xf32>
    %132 = arith.subf %126, %131 : vector<2x2xf32>
    %c3_53 = arith.constant 3 : index
    %c0_54 = arith.constant 0 : index
    %c0_55 = arith.constant 0 : index
    %133 = vector.load %arg7[%c3_53, %c0_54, %c0_55] : memref<4x2x2xf32, #tpu.memory_space<vmem>>, vector<1x2x2xf32>
    %134 = vector.shape_cast %133 : vector<1x2x2xf32> to vector<2x2xf32>
    %135 = vector.shape_cast %132 : vector<2x2xf32> to vector<1x2x2xf32>
    tpu.vector_store %arg7[%c3_53, %c0_54, %c0_55], %135 {strides = array<i32>} : memref<4x2x2xf32, #tpu.memory_space<vmem>>, vector<1x2x2xf32>,
    %c2_56 = arith.constant 2 : index
    %c0_57 = arith.constant 0 : index
    %c0_58 = arith.constant 0 : index
    %136 = vector.load %arg1[%c2_56, %c0_57, %c0_58] : memref<4x2x128xf32, #tpu.memory_space<vmem>>, vector<1x2x128xf32>
    %137 = vector.shape_cast %136 : vector<1x2x128xf32> to vector<2x128xf32>
    %cst_59 = arith.constant dense<0.000000e+00> : vector<2x128xf32>
    %138 = tpu.matmul %115, %1, %cst_59 {dimension_numbers = #tpu.dot_dimension_numbers<[1], [0], [0], [1], [0, 0, 1, 1], [], []>} : vector<2x32xf32>, vector<32x128xf32>, vector<2x128xf32> -> vector<2x128xf32>
    %139 = arith.addf %137, %138 : vector<2x128xf32>
    %140 = arith.negf %139 : vector<2x128xf32>
    %141 = math.exp %140 : vector<2x128xf32>
    %cst_60 = arith.constant 1.000000e+00 : f32
    %142 = vector.broadcast %cst_60 : f32 to vector<2x128xf32>
    %143 = arith.addf %142, %141 : vector<2x128xf32>
    %144 = arith.divf %142, %143 : vector<2x128xf32>
    %145 = vector.extract_strided_slice %144 {offsets = [0, 0], sizes = [2, 32], strides = [1, 1]} : vector<2x128xf32> to vector<2x32xf32>
    %146 = vector.extract_strided_slice %144 {offsets = [0, 32], sizes = [2, 32], strides = [1, 1]} : vector<2x128xf32> to vector<2x32xf32>
    %147 = vector.extract_strided_slice %144 {offsets = [0, 96], sizes = [2, 32], strides = [1, 1]} : vector<2x128xf32> to vector<2x32xf32>
    %148 = vector.extract_strided_slice %139 {offsets = [0, 64], sizes = [2, 32], strides = [1, 1]} : vector<2x128xf32> to vector<2x32xf32>
    %149 = math.tanh %148 : vector<2x32xf32>
    %150 = arith.mulf %146, %113 : vector<2x32xf32>
    %151 = arith.mulf %145, %149 : vector<2x32xf32>
    %152 = arith.addf %150, %151 : vector<2x32xf32>
    %153 = math.tanh %152 : vector<2x32xf32>
    %154 = arith.mulf %147, %153 : vector<2x32xf32>
    %c2_61 = arith.constant 2 : index
    %c0_62 = arith.constant 0 : index
    %c0_63 = arith.constant 0 : index
    %155 = vector.load %arg8[%c2_61, %c0_62, %c0_63] : memref<4x2x32xf32, #tpu.memory_space<vmem>>, vector<1x2x32xf32>
    %156 = vector.shape_cast %155 : vector<1x2x32xf32> to vector<2x32xf32>
    %cst_64 = arith.constant dense<0.000000e+00> : vector<2x2xf32>
    %157 = tpu.matmul %156, %2, %cst_64 {dimension_numbers = #tpu.dot_dimension_numbers<[1], [0], [0], [1], [0, 0, 1, 1], [], []>} : vector<2x32xf32>, vector<32x2xf32>, vector<2x2xf32> -> vector<2x2xf32>
    %cst_65 = arith.constant dense<0.000000e+00> : vector<2x2xf32>
    %158 = tpu.matmul %154, %3, %cst_65 {dimension_numbers = #tpu.dot_dimension_numbers<[1], [0], [0], [1], [0, 0, 1, 1], [], []>} : vector<2x32xf32>, vector<32x2xf32>, vector<2x2xf32> -> vector<2x2xf32>
    %159 = arith.addf %157, %158 : vector<2x2xf32>
    %160 = vector.broadcast %4 : vector<1x2xf32> to vector<2x2xf32>
    %161 = arith.addf %159, %160 : vector<2x2xf32>
    %cst_66 = arith.constant dense<0xFF800000> : vector<2xf32>
    %162 = vector.multi_reduction <maximumf>, %161, %cst_66 [1] : vector<2x2xf32> to vector<2xf32>
    %163 = vector.shape_cast %162 : vector<2xf32> to vector<2x1xf32>
    %164 = vector.broadcast %163 : vector<2x1xf32> to vector<2x2xf32>
    %165 = arith.subf %161, %164 : vector<2x2xf32>
    %166 = math.exp %165 : vector<2x2xf32>
    %cst_67 = arith.constant dense<0.000000e+00> : vector<2xf32>
    %167 = vector.multi_reduction <add>, %166, %cst_67 [1] : vector<2x2xf32> to vector<2xf32>
    %168 = vector.shape_cast %167 : vector<2xf32> to vector<2x1xf32>
    %169 = math.log %168 : vector<2x1xf32>
    %170 = vector.broadcast %169 : vector<2x1xf32> to vector<2x2xf32>
    %171 = arith.subf %165, %170 : vector<2x2xf32>
    %c2_68 = arith.constant 2 : index
    %c0_69 = arith.constant 0 : index
    %c0_70 = arith.constant 0 : index
    %172 = vector.load %arg7[%c2_68, %c0_69, %c0_70] : memref<4x2x2xf32, #tpu.memory_space<vmem>>, vector<1x2x2xf32>
    %173 = vector.shape_cast %172 : vector<1x2x2xf32> to vector<2x2xf32>
    %174 = vector.shape_cast %171 : vector<2x2xf32> to vector<1x2x2xf32>
    tpu.vector_store %arg7[%c2_68, %c0_69, %c0_70], %174 {strides = array<i32>} : memref<4x2x2xf32, #tpu.memory_space<vmem>>, vector<1x2x2xf32>,
    %c1_71 = arith.constant 1 : index
    %c0_72 = arith.constant 0 : index
    %c0_73 = arith.constant 0 : index
    %175 = vector.load %arg1[%c1_71, %c0_72, %c0_73] : memref<4x2x128xf32, #tpu.memory_space<vmem>>, vector<1x2x128xf32>
    %176 = vector.shape_cast %175 : vector<1x2x128xf32> to vector<2x128xf32>
    %cst_74 = arith.constant dense<0.000000e+00> : vector<2x128xf32>
    %177 = tpu.matmul %154, %1, %cst_74 {dimension_numbers = #tpu.dot_dimension_numbers<[1], [0], [0], [1], [0, 0, 1, 1], [], []>} : vector<2x32xf32>, vector<32x128xf32>, vector<2x128xf32> -> vector<2x128xf32>
    %178 = arith.addf %176, %177 : vector<2x128xf32>
    %179 = arith.negf %178 : vector<2x128xf32>
    %180 = math.exp %179 : vector<2x128xf32>
    %cst_75 = arith.constant 1.000000e+00 : f32
    %181 = vector.broadcast %cst_75 : f32 to vector<2x128xf32>
    %182 = arith.addf %181, %180 : vector<2x128xf32>
    %183 = arith.divf %181, %182 : vector<2x128xf32>
    %184 = vector.extract_strided_slice %183 {offsets = [0, 0], sizes = [2, 32], strides = [1, 1]} : vector<2x128xf32> to vector<2x32xf32>
    %185 = vector.extract_strided_slice %183 {offsets = [0, 32], sizes = [2, 32], strides = [1, 1]} : vector<2x128xf32> to vector<2x32xf32>
    %186 = vector.extract_strided_slice %183 {offsets = [0, 96], sizes = [2, 32], strides = [1, 1]} : vector<2x128xf32> to vector<2x32xf32>
    %187 = vector.extract_strided_slice %178 {offsets = [0, 64], sizes = [2, 32], strides = [1, 1]} : vector<2x128xf32> to vector<2x32xf32>
    %188 = math.tanh %187 : vector<2x32xf32>
    %189 = arith.mulf %185, %152 : vector<2x32xf32>
    %190 = arith.mulf %184, %188 : vector<2x32xf32>
    %191 = arith.addf %189, %190 : vector<2x32xf32>
    %192 = math.tanh %191 : vector<2x32xf32>
    %193 = arith.mulf %186, %192 : vector<2x32xf32>
    %c1_76 = arith.constant 1 : index
    %c0_77 = arith.constant 0 : index
    %c0_78 = arith.constant 0 : index
    %194 = vector.load %arg8[%c1_76, %c0_77, %c0_78] : memref<4x2x32xf32, #tpu.memory_space<vmem>>, vector<1x2x32xf32>
    %195 = vector.shape_cast %194 : vector<1x2x32xf32> to vector<2x32xf32>
    %cst_79 = arith.constant dense<0.000000e+00> : vector<2x2xf32>
    %196 = tpu.matmul %195, %2, %cst_79 {dimension_numbers = #tpu.dot_dimension_numbers<[1], [0], [0], [1], [0, 0, 1, 1], [], []>} : vector<2x32xf32>, vector<32x2xf32>, vector<2x2xf32> -> vector<2x2xf32>
    %cst_80 = arith.constant dense<0.000000e+00> : vector<2x2xf32>
    %197 = tpu.matmul %193, %3, %cst_80 {dimension_numbers = #tpu.dot_dimension_numbers<[1], [0], [0], [1], [0, 0, 1, 1], [], []>} : vector<2x32xf32>, vector<32x2xf32>, vector<2x2xf32> -> vector<2x2xf32>
    %198 = arith.addf %196, %197 : vector<2x2xf32>
    %199 = vector.broadcast %4 : vector<1x2xf32> to vector<2x2xf32>
    %200 = arith.addf %198, %199 : vector<2x2xf32>
    %cst_81 = arith.constant dense<0xFF800000> : vector<2xf32>
    %201 = vector.multi_reduction <maximumf>, %200, %cst_81 [1] : vector<2x2xf32> to vector<2xf32>
    %202 = vector.shape_cast %201 : vector<2xf32> to vector<2x1xf32>
    %203 = vector.broadcast %202 : vector<2x1xf32> to vector<2x2xf32>
    %204 = arith.subf %200, %203 : vector<2x2xf32>
    %205 = math.exp %204 : vector<2x2xf32>
    %cst_82 = arith.constant dense<0.000000e+00> : vector<2xf32>
    %206 = vector.multi_reduction <add>, %205, %cst_82 [1] : vector<2x2xf32> to vector<2xf32>
    %207 = vector.shape_cast %206 : vector<2xf32> to vector<2x1xf32>
    %208 = math.log %207 : vector<2x1xf32>
    %209 = vector.broadcast %208 : vector<2x1xf32> to vector<2x2xf32>
    %210 = arith.subf %204, %209 : vector<2x2xf32>
    %c1_83 = arith.constant 1 : index
    %c0_84 = arith.constant 0 : index
    %c0_85 = arith.constant 0 : index
    %211 = vector.load %arg7[%c1_83, %c0_84, %c0_85] : memref<4x2x2xf32, #tpu.memory_space<vmem>>, vector<1x2x2xf32>
    %212 = vector.shape_cast %211 : vector<1x2x2xf32> to vector<2x2xf32>
    %213 = vector.shape_cast %210 : vector<2x2xf32> to vector<1x2x2xf32>
    tpu.vector_store %arg7[%c1_83, %c0_84, %c0_85], %213 {strides = array<i32>} : memref<4x2x2xf32, #tpu.memory_space<vmem>>, vector<1x2x2xf32>,
    %c0_86 = arith.constant 0 : index
    %c0_87 = arith.constant 0 : index
    %c0_88 = arith.constant 0 : index
    %214 = vector.load %arg1[%c0_86, %c0_87, %c0_88] : memref<4x2x128xf32, #tpu.memory_space<vmem>>, vector<1x2x128xf32>
    %215 = vector.shape_cast %214 : vector<1x2x128xf32> to vector<2x128xf32>
    %cst_89 = arith.constant dense<0.000000e+00> : vector<2x128xf32>
    %216 = tpu.matmul %193, %1, %cst_89 {dimension_numbers = #tpu.dot_dimension_numbers<[1], [0], [0], [1], [0, 0, 1, 1], [], []>} : vector<2x32xf32>, vector<32x128xf32>, vector<2x128xf32> -> vector<2x128xf32>
    %217 = arith.addf %215, %216 : vector<2x128xf32>
    %218 = arith.negf %217 : vector<2x128xf32>
    %219 = math.exp %218 : vector<2x128xf32>
    %cst_90 = arith.constant 1.000000e+00 : f32
    %220 = vector.broadcast %cst_90 : f32 to vector<2x128xf32>
    %221 = arith.addf %220, %219 : vector<2x128xf32>
    %222 = arith.divf %220, %221 : vector<2x128xf32>
    %223 = vector.extract_strided_slice %222 {offsets = [0, 0], sizes = [2, 32], strides = [1, 1]} : vector<2x128xf32> to vector<2x32xf32>
    %224 = vector.extract_strided_slice %222 {offsets = [0, 32], sizes = [2, 32], strides = [1, 1]} : vector<2x128xf32> to vector<2x32xf32>
    %225 = vector.extract_strided_slice %222 {offsets = [0, 96], sizes = [2, 32], strides = [1, 1]} : vector<2x128xf32> to vector<2x32xf32>
    %226 = vector.extract_strided_slice %217 {offsets = [0, 64], sizes = [2, 32], strides = [1, 1]} : vector<2x128xf32> to vector<2x32xf32>
    %227 = math.tanh %226 : vector<2x32xf32>
    %228 = arith.mulf %224, %191 : vector<2x32xf32>
    %229 = arith.mulf %223, %227 : vector<2x32xf32>
    %230 = arith.addf %228, %229 : vector<2x32xf32>
    %231 = math.tanh %230 : vector<2x32xf32>
    %232 = arith.mulf %225, %231 : vector<2x32xf32>
    %c0_91 = arith.constant 0 : index
    %c0_92 = arith.constant 0 : index
    %c0_93 = arith.constant 0 : index
    %233 = vector.load %arg8[%c0_91, %c0_92, %c0_93] : memref<4x2x32xf32, #tpu.memory_space<vmem>>, vector<1x2x32xf32>
    %234 = vector.shape_cast %233 : vector<1x2x32xf32> to vector<2x32xf32>
    %cst_94 = arith.constant dense<0.000000e+00> : vector<2x2xf32>
    %235 = tpu.matmul %234, %2, %cst_94 {dimension_numbers = #tpu.dot_dimension_numbers<[1], [0], [0], [1], [0, 0, 1, 1], [], []>} : vector<2x32xf32>, vector<32x2xf32>, vector<2x2xf32> -> vector<2x2xf32>
    %cst_95 = arith.constant dense<0.000000e+00> : vector<2x2xf32>
    %236 = tpu.matmul %232, %3, %cst_95 {dimension_numbers = #tpu.dot_dimension_numbers<[1], [0], [0], [1], [0, 0, 1, 1], [], []>} : vector<2x32xf32>, vector<32x2xf32>, vector<2x2xf32> -> vector<2x2xf32>
    %237 = arith.addf %235, %236 : vector<2x2xf32>
    %238 = vector.broadcast %4 : vector<1x2xf32> to vector<2x2xf32>
    %239 = arith.addf %237, %238 : vector<2x2xf32>
    %cst_96 = arith.constant dense<0xFF800000> : vector<2xf32>
    %240 = vector.multi_reduction <maximumf>, %239, %cst_96 [1] : vector<2x2xf32> to vector<2xf32>
    %241 = vector.shape_cast %240 : vector<2xf32> to vector<2x1xf32>
    %242 = vector.broadcast %241 : vector<2x1xf32> to vector<2x2xf32>
    %243 = arith.subf %239, %242 : vector<2x2xf32>
    %244 = math.exp %243 : vector<2x2xf32>
    %cst_97 = arith.constant dense<0.000000e+00> : vector<2xf32>
    %245 = vector.multi_reduction <add>, %244, %cst_97 [1] : vector<2x2xf32> to vector<2xf32>
    %246 = vector.shape_cast %245 : vector<2xf32> to vector<2x1xf32>
    %247 = math.log %246 : vector<2x1xf32>
    %248 = vector.broadcast %247 : vector<2x1xf32> to vector<2x2xf32>
    %249 = arith.subf %243, %248 : vector<2x2xf32>
    %c0_98 = arith.constant 0 : index
    %c0_99 = arith.constant 0 : index
    %c0_100 = arith.constant 0 : index
    %250 = vector.load %arg7[%c0_98, %c0_99, %c0_100] : memref<4x2x2xf32, #tpu.memory_space<vmem>>, vector<1x2x2xf32>
    %251 = vector.shape_cast %250 : vector<1x2x2xf32> to vector<2x2xf32>
    %252 = vector.shape_cast %249 : vector<2x2xf32> to vector<1x2x2xf32>
    tpu.vector_store %arg7[%c0_98, %c0_99, %c0_100], %252 {strides = array<i32>} : memref<4x2x2xf32, #tpu.memory_space<vmem>>, vector<1x2x2xf32>,
    return
  }
}

</mosaic_0001>

<bundles_post_ra>
// kernel: lstm_forward.2
= control target key start
LH: loop header
LB: loop body
LE: loop exit
PB: predicated region body
PF: predicated region fallthrough
CT: control target
= control target key end

     0   :  { %v1092_v0 = vmov 0.0|0.0   ;;  %vm1093_vm0 = vmmov 0   ;;  %v1094_v4 = vmov 0.0   ;;  %s1095_s30 = smov 64   ;;  %s1096_s7 = smov 32   ;;  %vm28_vm1 = vcmask 261120   ;;  %s1279_s1 = inlined_call_operand.vmem [shape: f32[32,128], index: 1, kind: input, shape index: {}]   ;;  %s1280_s0 = inlined_call_operand.vmem [shape: f32[6,8,128], index: 0, kind: input, shape index: {}]   ;;  %s1281_s2 = inlined_call_operand.vmem [shape: f32[8,128], index: 2, kind: input, shape index: {}]   ;;  %s1282_s4 = inlined_call_operand.vmem [shape: f32[32,64], index: 4, kind: input, shape index: {}]   ;;  %s1283_s3 = inlined_call_operand.vmem [shape: f32[32,64], index: 3, kind: input, shape index: {}]   ;;  %s1284_s5 = inlined_call_operand.vmem [shape: f32[1,64], index: 5, kind: input, shape index: {}]   ;;  %s1285_s6 = inlined_call_operand.vmem [shape: f32[8,64], index: 6, kind: output, shape index: {}]  }
   0x1   :  { %983 = vmatprep.subr.bf16.mxu0 %v1092_v0  ;;  %v23_v1 = vld [vmem:[%s1279_s1] sm:$0xff]  ;;  %v24_v2 = vld [vmem:[%s1279_s1 + $0x8] sm:$0xff]  ;;  %v25_v3 = vld [vmem:[%s1279_s1 + $0x10] sm:$0xff]  ;;  %903 = vmatprep.mubr.msk.f32.mxu0 %vm1093_vm0, %v1094_v4  ;;  %vm829_vm2 = vcmask 523264  }
   0x2   :  { %v1144_v5 = vpack.c.bf16 %v24_v2, %v23_v1  ;;  %v26_v6 = vld [vmem:[%s1279_s1 + $0x18] sm:$0xff]  ;;  %989 = vmatprep.subr.bf16.mxu1 %v1092_v0  ;;  %914 = vmatprep.mubr.msk.f32.mxu1 %vm1093_vm0, %v1094_v4  ;;  %v27_v8 = vld [vmem:[%s1280_s0] sm:$0xff]  ;;  %v836_v26 = vld [vmem:[%s1280_s0 + $0x8] sm:$0xff] }
   0x3   :  { %v1153_v7 = vpack.c.bf16 %v26_v6, %v25_v3  ;;  %v839_v44 = vld [vmem:[%s1280_s0 + $0x10] sm:$0xff]  ;;  %v842_v62 = vld [vmem:[%s1280_s0 + $0x18] sm:$0xff] }
   0x4   :  { %985 = vmatpush3.bf16.msra.mxu0 %v1144_v5  ;;  %991 = vmatpush3.bf16.msra.mxu1 %v1144_v5 }
   0x5   :  { %986 = vmatprep.subr.bf16.mxu0 %v1092_v0  ;;  %992 = vmatprep.subr.bf16.mxu1 %v1092_v0 }
   0x8   :  { %988 = vmatpush3.bf16.msra.mxu0 %v1153_v7  ;;  %994 = vmatpush3.bf16.msra.mxu1 %v1153_v7 }
   0x9   :  { %995 = vmatprep.subr.bf16.mxu0 %v1092_v0  ;;  %1001 = vmatprep.subr.bf16.mxu1 %v1092_v0 }
   0xb   :  { %904 = vmatmul.mubr.f32.vlgmr.msra.gmra.mrb[0].mxu0 %v1094_v4 }
   0xc   :  { %997 = vmatpush3.bf16.msra.mxu0 %v1144_v5  ;;  %925 = vmatprep.mubr.msk.f32.mxu0 %vm1093_vm0, %v1094_v4 }
   0xd   :  { %998 = vmatprep.subr.bf16.mxu0 %v1092_v0 }
  0x10   :  { %1000 = vmatpush3.bf16.msra.mxu0 %v1153_v7 }
  0x11   :  { %1007 = vmatprep.subr.bf16.mxu0 %v1092_v0 }
  0xde   :  { %v98_v9 = vpop.f32.mrb[0].mxu0 }
  0xdf   :  { %v102_v10 = vadd.f32 %v98_v9, %v27_v8  ;;  %v905_v11 = vpop.f32.mrb[1].mxu0 }
  0xe1   :  { %1036 = vtanh.f32 %v102_v10  ;;  %v835_v13 = vmul.f32 -1.442695, %v102_v10 }
  0xe3   :  { %1038 = vpow2.f32 %v835_v13 }
  0xeb   :  { %v1037_v12 = vpop.eup %1036 }
  0xec   :  { %112 = vrot.lane.b32.xlu0 %v1037_v12, %s1095_s30 }
  0xed   :  { %v1039_v14 = vpop.eup %1038 }
  0xee   :  { %v106_v15 = vadd.f32 1.0, %v1039_v14 }
  0xf0   :  { %1040 = vrcp.f32 %v106_v15 }
  0xfa   :  { %v1041_v16 = vpop.eup %1040 }
  0xfb   :  { %v110_v19 = vmul.f32 0.0, %v1041_v16 }
 0x15e   :  { %v113_v17 = vpop.permute.xlu0 %112 }
 0x15f   :  { %v115_v18 = vmul.f32 %v1041_v16, %v113_v17 }
 0x161   :  { %117 = vrot.lane.b32.xlu0 %v115_v18, %s1096_s7  ;;  %v845_v18 = vld [vmem:[%s1280_s0 + $0x20] sm:$0xff] }
 0x1d3   :  { %v118_v20 = vpop.permute.xlu0 %117 }
 0x1d4   :  { %v120_v21 = vadd.f32 %v118_v20, %v110_v19 }
 0x1d6   :  { %1042 = vtanh.f32 %v120_v21 }
 0x1e0   :  { %v1043_v22 = vpop.eup %1042 }
 0x1e1   :  { %123 = vrot.lane.b32.xlu1 %v1043_v22, %s1095_s30 }
 0x253   :  { %v124_v23 = vpop.permute.xlu1 %123 }
 0x254   :  { %v126_v24 = vmul.f32 %v1041_v16, %v124_v23 }
 0x256   :  { %130 = vrot.lane.b32.xlu1 %v126_v24, %s1096_s7 }
 0x2c8   :  { %v131_v25 = vpop.permute.xlu1 %130 }
 0x2c9   :  { %915 = vmatmul.mubr.msk.f32.vlgmr.msra.gmra.mrb[0].mxu1 %vm28_vm1, %v131_v25 }
 0x2ca   :  { %1003 = vmatpush3.bf16.msra.mxu1 %v1144_v5  ;;  %936 = vmatprep.mubr.msk.f32.mxu1 %vm1093_vm0, %v1094_v4 }
 0x2cb   :  { %1004 = vmatprep.subr.bf16.mxu1 %v1092_v0 }
 0x2ce   :  { %1006 = vmatpush3.bf16.msra.mxu1 %v1153_v7 }
 0x2cf   :  { %1013 = vmatprep.subr.bf16.mxu1 %v1092_v0 }
 0x39c   :  { %v200_v27 = vpop.f32.mrb[0].mxu1 }
 0x39d   :  { %v204_v28 = vadd.f32 %v836_v26, %v200_v27  ;;  %v916_v29 = vpop.f32.mrb[1].mxu1 }
 0x39f   :  { %1044 = vtanh.f32 %v204_v28  ;;  %v838_v31 = vmul.f32 -1.442695, %v204_v28 }
 0x3a1   :  { %1046 = vpow2.f32 %v838_v31 }
 0x3a9   :  { %v1045_v30 = vpop.eup %1044 }
 0x3aa   :  { %214 = vrot.lane.b32.xlu0 %v1045_v30, %s1095_s30 }
 0x3ab   :  { %v1047_v32 = vpop.eup %1046 }
 0x3ac   :  { %v208_v33 = vadd.f32 1.0, %v1047_v32 }
 0x3ae   :  { %1048 = vrcp.f32 %v208_v33 }
 0x3b8   :  { %v1049_v34 = vpop.eup %1048 }
 0x3b9   :  { %v212_v37 = vmul.f32 %v1049_v34, %v120_v21 }
 0x41c   :  { %v215_v35 = vpop.permute.xlu0 %214 }
 0x41d   :  { %v217_v36 = vmul.f32 %v1049_v34, %v215_v35 }
 0x41f   :  { %219 = vrot.lane.b32.xlu1 %v217_v36, %s1096_s7  ;;  %v637_v36 = vld [vmem:[%s1281_s2] sm:$0xff] }
 0x491   :  { %v220_v38 = vpop.permute.xlu1 %219 }
 0x492   :  { %v222_v39 = vadd.f32 %v220_v38, %v212_v37  ;;  %v851_v38 = vmul.f32 -1.442695, %v637_v36 }
 0x494   :  { %1050 = vtanh.f32 %v222_v39 }
 0x49e   :  { %v1051_v40 = vpop.eup %1050 }
 0x49f   :  { %225 = vrot.lane.b32.xlu0 %v1051_v40, %s1095_s30 }
 0x511   :  { %v226_v41 = vpop.permute.xlu0 %225 }
 0x512   :  { %v228_v42 = vmul.f32 %v1049_v34, %v226_v41 }
 0x514   :  { %232 = vrot.lane.b32.xlu1 %v228_v42, %s1096_s7  ;;  %v848_v42 = vld [vmem:[%s1280_s0 + $0x28] sm:$0xff] }
 0x586   :  { %v233_v43 = vpop.permute.xlu1 %232 }
 0x587   :  { %926 = vmatmul.mubr.msk.f32.vlgmr.msra.gmra.mrb[2].mxu0 %vm28_vm1, %v233_v43 }
 0x588   :  { %1009 = vmatpush3.bf16.msra.mxu0 %v1144_v5  ;;  %947 = vmatprep.mubr.msk.f32.mxu0 %vm1093_vm0, %v1094_v4 }
 0x589   :  { %1010 = vmatprep.subr.bf16.mxu0 %v1092_v0 }
 0x58c   :  { %1012 = vmatpush3.bf16.msra.mxu0 %v1153_v7 }
 0x58d   :  { %1019 = vmatprep.subr.bf16.mxu0 %v1092_v0 }
 0x65a   :  { %v302_v45 = vpop.f32.mrb[2].mxu0 }
 0x65b   :  { %v306_v46 = vadd.f32 %v839_v44, %v302_v45  ;;  %v927_v47 = vpop.f32.mrb[3].mxu0 }
 0x65d   :  { %1052 = vtanh.f32 %v306_v46  ;;  %v841_v49 = vmul.f32 -1.442695, %v306_v46 }
 0x65f   :  { %1054 = vpow2.f32 %v841_v49 }
 0x667   :  { %v1053_v48 = vpop.eup %1052 }
 0x668   :  { %316 = vrot.lane.b32.xlu0 %v1053_v48, %s1095_s30 }
 0x669   :  { %v1055_v50 = vpop.eup %1054 }
 0x66a   :  { %v310_v51 = vadd.f32 1.0, %v1055_v50 }
 0x66c   :  { %1056 = vrcp.f32 %v310_v51 }
 0x676   :  { %v1057_v52 = vpop.eup %1056 }
 0x677   :  { %v314_v55 = vmul.f32 %v1057_v52, %v222_v39 }
 0x6da   :  { %v317_v53 = vpop.permute.xlu0 %316 }
 0x6db   :  { %v319_v54 = vmul.f32 %v1057_v52, %v317_v53 }
 0x6dd   :  { %321 = vrot.lane.b32.xlu1 %v319_v54, %s1096_s7 }
 0x74f   :  { %v322_v56 = vpop.permute.xlu1 %321 }
 0x750   :  { %v324_v57 = vadd.f32 %v322_v56, %v314_v55 }
 0x752   :  { %1058 = vtanh.f32 %v324_v57 }
 0x75c   :  { %v1059_v58 = vpop.eup %1058 }
 0x75d   :  { %327 = vrot.lane.b32.xlu0 %v1059_v58, %s1095_s30 }
 0x7cf   :  { %v328_v59 = vpop.permute.xlu0 %327 }
 0x7d0   :  { %v330_v60 = vmul.f32 %v1057_v52, %v328_v59 }
 0x7d2   :  { %334 = vrot.lane.b32.xlu1 %v330_v60, %s1096_s7 }
 0x844   :  { %v335_v61 = vpop.permute.xlu1 %334 }
 0x845   :  { %937 = vmatmul.mubr.msk.f32.vlgmr.msra.gmra.mrb[2].mxu1 %vm28_vm1, %v335_v61  ;;  %v666_v61 = vld [vmem:[%s1282_s4] sm:$0xff] }
 0x846   :  { %1015 = vmatpush3.bf16.msra.mxu1 %v1144_v5  ;;  %958 = vmatprep.mubr.msk.f32.mxu1 %vm1093_vm0, %v1094_v4 }
 0x847   :  { %1016 = vmatprep.subr.bf16.mxu1 %v1092_v0 }
 0x84a   :  { %1018 = vmatpush3.bf16.msra.mxu1 %v1153_v7 }
 0x84b   :  { %1025 = vmatprep.subr.bf16.mxu1 %v1092_v0 }
 0x918   :  { %v404_v63 = vpop.f32.mrb[2].mxu1 }
 0x919   :  { %v408_v1 = vadd.f32 %v842_v62, %v404_v63  ;;  %v938_v2 = vpop.f32.mrb[3].mxu1  ;;  %v667_v62 = vld [vmem:[%s1282_s4 + $0x8] sm:$0xff]  ;;  %v662_v63 = vld [vmem:[%s1283_s3] sm:$0xff] }
 0x91a   :  { %v663_v2 = vld [vmem:[%s1283_s3 + $0x8] sm:$0xff] }
 0x91b   :  { %1060 = vtanh.f32 %v408_v1  ;;  %v844_v5 = vmul.f32 -1.442695, %v408_v1  ;;  %v1020_v1 = vpack.c.bf16 %v667_v62, %v666_v61 }
 0x91d   :  { %1062 = vpow2.f32 %v844_v5  ;;  %v669_v5 = vld [vmem:[%s1282_s4 + $0x18] sm:$0xff] }
 0x925   :  { %v1061_v3 = vpop.eup %1060 }
 0x926   :  { %418 = vrot.lane.b32.xlu0 %v1061_v3, %s1095_s30  ;;  %v668_v3 = vld [vmem:[%s1282_s4 + $0x10] sm:$0xff] }
 0x927   :  { %v1063_v6 = vpop.eup %1062 }
 0x928   :  { %v412_v8 = vadd.f32 1.0, %v1063_v6  ;;  %v1026_v6 = vpack.c.bf16 %v663_v2, %v662_v63 }
 0x92a   :  { %1064 = vrcp.f32 %v412_v8  ;;  %v664_v8 = vld [vmem:[%s1283_s3 + $0x10] sm:$0xff] }
 0x934   :  { %v1065_v9 = vpop.eup %1064 }
 0x935   :  { %v416_v11 = vmul.f32 %v1065_v9, %v324_v57 }
 0x998   :  { %v419_v7 = vpop.permute.xlu0 %418 }
 0x999   :  { %v421_v10 = vmul.f32 %v1065_v9, %v419_v7  ;;  %v1023_v7 = vpack.c.bf16 %v669_v5, %v668_v3 }
 0x99b   :  { %423 = vrot.lane.b32.xlu1 %v421_v10, %s1096_s7 }
 0xa0d   :  { %v424_v12 = vpop.permute.xlu1 %423 }
 0xa0e   :  { %v426_v13 = vadd.f32 %v424_v12, %v416_v11 }
 0xa10   :  { %1066 = vtanh.f32 %v426_v13 }
 0xa1a   :  { %v1067_v14 = vpop.eup %1066 }
 0xa1b   :  { %429 = vrot.lane.b32.xlu0 %v1067_v14, %s1095_s30 }
 0xa8d   :  { %v430_v15 = vpop.permute.xlu0 %429 }
 0xa8e   :  { %v432_v16 = vmul.f32 %v1065_v9, %v430_v15  ;;  %v665_v9 = vld [vmem:[%s1283_s3 + $0x18] sm:$0xff] }
 0xa8f   :  { %v1029_v10 = vpack.c.bf16 %v665_v9, %v664_v8 }
 0xa90   :  { %436 = vrot.lane.b32.xlu1 %v432_v16, %s1096_s7 }
 0xb02   :  { %v437_v17 = vpop.permute.xlu1 %436 }
 0xb03   :  { %948 = vmatmul.mubr.msk.f32.vlgmr.msra.gmra.mrb[4].mxu0 %vm28_vm1, %v437_v17 }
 0xb04   :  { %969 = vmatprep.mubr.msk.f32.mxu0 %vm1093_vm0, %v1094_v4  ;;  %1021 = vmatpush3.bf16.msra.mxu0 %v1020_v1 }
 0xb05   :  { %1022 = vmatprep.subr.bf16.mxu0 %v1092_v0 }
 0xb08   :  { %1024 = vmatpush3.bf16.msra.mxu0 %v1023_v7 }
 0xbd6   :  { %v506_v19 = vpop.f32.mrb[4].mxu0 }
 0xbd7   :  { %v510_v20 = vadd.f32 %v845_v18, %v506_v19  ;;  %v949_v21 = vpop.f32.mrb[5].mxu0 }
 0xbd9   :  { %1068 = vtanh.f32 %v510_v20  ;;  %v847_v23 = vmul.f32 -1.442695, %v510_v20  ;;  %v854_v20 = vld [vmem:[%s1284_s5] ss:$0 sm:$0xff] }
 0xbdb   :  { %1070 = vpow2.f32 %v847_v23 }
 0xbe3   :  { %v1069_v22 = vpop.eup %1068 }
 0xbe4   :  { %520 = vrot.lane.b32.xlu0 %v1069_v22, %s1095_s30 }
 0xbe5   :  { %v1071_v24 = vpop.eup %1070 }
 0xbe6   :  { %v514_v25 = vadd.f32 1.0, %v1071_v24 }
 0xbe8   :  { %1072 = vrcp.f32 %v514_v25 }
 0xbf2   :  { %v1073_v26 = vpop.eup %1072 }
 0xbf3   :  { %v518_v29 = vmul.f32 %v1073_v26, %v426_v13 }
 0xc56   :  { %v521_v27 = vpop.permute.xlu0 %520 }
 0xc57   :  { %v523_v28 = vmul.f32 %v1073_v26, %v521_v27 }
 0xc59   :  { %525 = vrot.lane.b32.xlu1 %v523_v28, %s1096_s7 }
 0xccb   :  { %v526_v30 = vpop.permute.xlu1 %525 }
 0xccc   :  { %v528_v31 = vadd.f32 %v526_v30, %v518_v29 }
 0xcce   :  { %1074 = vtanh.f32 %v528_v31 }
 0xccf   :  { %1076 = vtanh.f32 %v637_v36 }
 0xcd0   :  { %1078 = vpow2.f32 %v851_v38 }
 0xcd8   :  { %v1075_v32 = vpop.eup %1074 }
 0xcd9   :  { %531 = vrot.lane.b32.xlu0 %v1075_v32, %s1095_s30  ;;  %v1077_v37 = vpop.eup %1076 }
 0xcda   :  { %v1079_v39 = vpop.eup %1078 }
 0xcdb   :  { %v641_v40 = vadd.f32 1.0, %v1079_v39 }
 0xcdd   :  { %1080 = vrcp.f32 %v641_v40 }
 0xce7   :  { %v1081_v41 = vpop.eup %1080 }
 0xce8   :  { %v645_v50 = vmul.f32 0.0, %v1081_v41 }
 0xd4b   :  { %v532_v33 = vpop.permute.xlu0 %531 }
 0xd4c   :  { %v534_v34 = vmul.f32 %v1073_v26, %v532_v33 }
 0xd4e   :  { %538 = vrot.lane.b32.xlu1 %v534_v34, %s1096_s7 }
 0xd52   :  { %647 = vrot.lane.b32.xlu1 %v1077_v37, %s1095_s30 }
 0xdc0   :  { %v539_v35 = vpop.permute.xlu1 %538 }
 0xdc1   :  { %959 = vmatmul.mubr.msk.f32.vlgmr.msra.gmra.mrb[4].mxu1 %vm28_vm1, %v539_v35 }
 0xdc2   :  { %980 = vmatprep.mubr.msk.f32.mxu1 %vm1093_vm0, %v1094_v4  ;;  %1027 = vmatpush3.bf16.msra.mxu1 %v1026_v6 }
 0xdc3   :  { %1028 = vmatprep.subr.bf16.mxu1 %v1092_v0 }
 0xdc4   :  { %v648_v43 = vpop.permute.xlu1 %647 }
 0xdc5   :  { %v650_v44 = vmul.f32 %v1081_v41, %v648_v43 }
 0xdc6   :  { %1030 = vmatpush3.bf16.msra.mxu1 %v1029_v10 }
 0xdc7   :  { %652 = vrot.lane.b32.xlu1 %v650_v44, %s1096_s7 }
 0xe39   :  { %v653_v52 = vpop.permute.xlu1 %652 }
 0xe3a   :  { %v655_v53 = vadd.f32 %v653_v52, %v645_v50 }
 0xe94   :  { %v608_v4 = vpop.f32.mrb[4].mxu1 }
 0xe95   :  { %v612_v45 = vadd.f32 %v848_v42, %v608_v4  ;;  %v960_v46 = vpop.f32.mrb[5].mxu1 }
 0xe97   :  { %1082 = vtanh.f32 %v612_v45  ;;  %v850_v48 = vmul.f32 -1.442695, %v612_v45 }
 0xe99   :  { %1084 = vpow2.f32 %v850_v48 }
 0xea1   :  { %v1083_v47 = vpop.eup %1082 }
 0xea2   :  { %622 = vrot.lane.b32.xlu0 %v1083_v47, %s1095_s30 }
 0xea3   :  { %v1085_v49 = vpop.eup %1084 }
 0xea4   :  { %v616_v51 = vadd.f32 1.0, %v1085_v49 }
 0xea6   :  { %1086 = vrcp.f32 %v616_v51 }
 0xea7   :  { %1088 = vtanh.f32 %v655_v53 }
 0xeb0   :  { %v1087_v54 = vpop.eup %1086 }
 0xeb1   :  { %v1089_v56 = vpop.eup %1088  ;;  %v620_v58 = vmul.f32 %v1087_v54, %v528_v31 }
 0xeb2   :  { %658 = vrot.lane.b32.xlu1 %v1089_v56, %s1095_s30 }
 0xf14   :  { %v623_v55 = vpop.permute.xlu0 %622 }
 0xf15   :  { %v625_v57 = vmul.f32 %v1087_v54, %v623_v55 }
 0xf17   :  { %627 = vrot.lane.b32.xlu0 %v625_v57, %s1096_s7 }
 0xf24   :  { %v659_v11 = vpop.permute.xlu1 %658 }
 0xf25   :  { %v661_v13 = vmul.f32 %v1081_v41, %v659_v11 }
 0xf89   :  { %v628_v59 = vpop.permute.xlu0 %627 }
 0xf8a   :  { %v630_v60 = vadd.f32 %v628_v59, %v620_v58 }
 0xf8c   :  { %1090 = vtanh.f32 %v630_v60 }
 0xf96   :  { %v1091_v12 = vpop.eup %1090 }
 0xf97   :  { %633 = vrot.lane.b32.xlu0 %v1091_v12, %s1095_s30 }
 0xf9b   :  { %671 = vrot.lane.b32.xlu0 %v661_v13, %s1096_s7 }
0x1009   :  { %v634_v14 = vpop.permute.xlu0 %633 }
0x100a   :  { %v636_v15 = vmul.f32 %v1087_v54, %v634_v14 }
0x100c   :  { %746 = vrot.lane.b32.xlu1 %v636_v15, %s1096_s7 }
0x100d   :  { %v672_v16 = vpop.permute.xlu0 %671 }
0x100e   :  { %970 = vmatmul.mubr.msk.f32.vlgmr.msra.gmra.mrb[6].mxu0 %vm28_vm1, %v672_v16 }
0x107e   :  { %v747_v17 = vpop.permute.xlu1 %746 }
0x107f   :  { %981 = vmatmul.mubr.msk.f32.vlgmr.msra.gmra.mrb[6].mxu1 %vm28_vm1, %v747_v17 }
0x10e1   :  { %v741_v0 = vpop.f32.mrb[6].mxu0 }
0x10e2   :  { %v971_v18 = vpop.f32.mrb[7].mxu0 }
0x1152   :  { %v816_v19 = vpop.f32.mrb[6].mxu1 }
0x1153   :  { %v817_v21 = vadd.f32 %v816_v19, %v741_v0  ;;  %v982_v22 = vpop.f32.mrb[7].mxu1 }
0x1155   :  { %v827_v23 = vadd.f32 %v854_v20, %v817_v21 }
0x1157   :  { %v828_v24 = vmax.f32 %v827_v23, 0.0 }
0x1159   :  { %830 = vst.msk [vmem:[%s1285_s6] sm:$0xff] %vm829_vm2, %v828_v24 }

// kernel: lstm_forward.3
= control target key start
LH: loop header
LB: loop body
LE: loop exit
PB: predicated region body
PF: predicated region fallthrough
CT: control target
= control target key end

     0   :  { %v1986_v0 = vmov 0.0|0.0   ;;  %vm1987_vm0 = vmmov 0   ;;  %v1988_v4 = vmov 0.0   ;;  %s1989_s10 = smov 64   ;;  %s1990_s11 = smov 32   ;;  %vm147_vm1 = vcmask 254976   ;;  %s2305_s2 = inlined_call_operand.vmem [shape: f32[32,128], index: 2, kind: input, shape index: {}]   ;;  %s2306_s0 = inlined_call_operand.vmem [shape: f32[4,2,128], index: 0, kind: input, shape index: {}]   ;;  %s2307_s3 = inlined_call_operand.vmem [shape: f32[32,128], index: 3, kind: input, shape index: {}]   ;;  %s2308_s1 = inlined_call_operand.vmem [shape: f32[4,2,128], index: 1, kind: input, shape index: {}]   ;;  %s2309_s4 = inlined_call_operand.vmem [shape: f32[32,2], index: 4, kind: input, shape index: {}]   ;;  %s2310_s5 = inlined_call_operand.vmem [shape: f32[32,2], index: 5, kind: input, shape index: {}]   ;;  %s2311_s6 = inlined_call_operand.vmem [shape: f32[1,2], index: 6, kind: input, shape index: {}]   ;;  %s2312_s7 = inlined_call_operand.vmem [shape: f32[4,2,2], index: 7, kind: output, shape index: {}]  }
   0x1   :  { %1805 = vmatprep.subr.bf16.mxu0 %v1986_v0  ;;  %v26_v1 = vld [vmem:[%s2305_s2] sm:$0xff]  ;;  %v27_v2 = vld [vmem:[%s2305_s2 + $0x8] sm:$0xff]  ;;  %v28_v3 = vld [vmem:[%s2305_s2 + $0x10] sm:$0xff]  ;;  %1637 = vmatprep.mubr.msk.f32.mxu0 %vm1987_vm0, %v1988_v4  ;;  %vm44_vm2 = vcmask 261120   ;;  %vm717_vm3 = vcmask 9216  }
   0x2   :  { %v1806_v5 = vpack.c.bf16 %v27_v2, %v26_v1  ;;  %v29_v6 = vld [vmem:[%s2305_s2 + $0x18] sm:$0xff]  ;;  %1811 = vmatprep.subr.bf16.mxu1 %v1986_v0  ;;  %1648 = vmatprep.mubr.msk.f32.mxu1 %vm1987_vm0, %v1988_v4  ;;  %v43_v8 = vld [vmem:[%s2306_s0] sm:$0x3]  ;;  %v1518_v26 = vld [vmem:[%s2306_s0 + $0x2] sm:$0x3] }
   0x3   :  { %v1809_v7 = vpack.c.bf16 %v29_v6, %v28_v3  ;;  %v30_v43 = vld [vmem:[%s2307_s3] sm:$0xff]  ;;  %v31_v44 = vld [vmem:[%s2307_s3 + $0x8] sm:$0xff]  ;;  %v32_v46 = vld [vmem:[%s2307_s3 + $0x10] sm:$0xff] }
   0x4   :  { %1807 = vmatpush3.bf16.msra.mxu0 %v1806_v5  ;;  %1813 = vmatpush3.bf16.msra.mxu1 %v1806_v5  ;;  %v2084_v45 = vpack.c.bf16 %v31_v44, %v30_v43  ;;  %v33_v47 = vld [vmem:[%s2307_s3 + $0x18] sm:$0xff]  ;;  %v1521_v50 = vld [vmem:[%s2306_s0 + $0x4] sm:$0x3]  ;;  %v1527_v54 = vld [vmem:[%s2308_s1 + $0x6] sm:$0x3] }
   0x5   :  { %1808 = vmatprep.subr.bf16.mxu0 %v1986_v0  ;;  %1814 = vmatprep.subr.bf16.mxu1 %v1986_v0  ;;  %v2095_v49 = vpack.c.bf16 %v33_v47, %v32_v46  ;;  %v1533_v44 = vld [vmem:[%s2308_s1 + $0x4] sm:$0x3] }
   0x8   :  { %1810 = vmatpush3.bf16.msra.mxu0 %v1809_v7  ;;  %1816 = vmatpush3.bf16.msra.mxu1 %v1809_v7 }
   0x9   :  { %1817 = vmatprep.subr.bf16.mxu0 %v1986_v0  ;;  %1823 = vmatprep.subr.bf16.mxu1 %v1986_v0 }
   0xb   :  { %1638 = vmatmul.mubr.f32.vlgmr.msra.gmra.mrb[0].mxu0 %v1988_v4 }
   0xc   :  { %1819 = vmatpush3.bf16.msra.mxu0 %v1806_v5  ;;  %1659 = vmatprep.mubr.msk.f32.mxu0 %vm1987_vm0, %v1988_v4 }
   0xd   :  { %1820 = vmatprep.subr.bf16.mxu0 %v1986_v0 }
  0x10   :  { %1822 = vmatpush3.bf16.msra.mxu0 %v1809_v7 }
  0x11   :  { %1829 = vmatprep.subr.bf16.mxu0 %v1986_v0 }
  0xde   :  { %v114_v9 = vpop.f32.mrb[0].mxu0 }
  0xdf   :  { %v118_v10 = vadd.f32 %v114_v9, %v43_v8  ;;  %v1639_v11 = vpop.f32.mrb[1].mxu0 }
  0xe1   :  { %1906 = vtanh.f32 %v118_v10  ;;  %v1517_v13 = vmul.f32 -1.442695, %v118_v10 }
  0xe3   :  { %1908 = vpow2.f32 %v1517_v13 }
  0xeb   :  { %v1907_v12 = vpop.eup %1906 }
  0xec   :  { %128 = vrot.lane.b32.xlu0 %v1907_v12, %s1989_s10 }
  0xed   :  { %v1909_v14 = vpop.eup %1908 }
  0xee   :  { %v122_v15 = vadd.f32 1.0, %v1909_v14 }
  0xf0   :  { %1910 = vrcp.f32 %v122_v15 }
  0xfa   :  { %v1911_v16 = vpop.eup %1910 }
  0xfb   :  { %v126_v19 = vmul.f32 0.0, %v1911_v16 }
 0x15e   :  { %v129_v17 = vpop.permute.xlu0 %128 }
 0x15f   :  { %v131_v18 = vmul.f32 %v1911_v16, %v129_v17 }
 0x161   :  { %133 = vrot.lane.b32.xlu0 %v131_v18, %s1990_s11 }
 0x1d3   :  { %v134_v20 = vpop.permute.xlu0 %133 }
 0x1d4   :  { %v136_v21 = vadd.f32 %v134_v20, %v126_v19  ;;  %v34_v20 = vld [vmem:[%s2309_s4] sm:$0xff] }
 0x1d6   :  { %1912 = vtanh.f32 %v136_v21 }
 0x1e0   :  { %v1913_v22 = vpop.eup %1912 }
 0x1e1   :  { %139 = vrot.lane.b32.xlu1 %v1913_v22, %s1989_s10 }
 0x253   :  { %v140_v23 = vpop.permute.xlu1 %139 }
 0x254   :  { %v142_v24 = vmul.f32 %v1911_v16, %v140_v23 }
 0x256   :  { %144 = vrot.lane.b32.xlu1 %v142_v24, %s1990_s11  ;;  %v36_v24 = vld [vmem:[%s2309_s4 + $0x10] sm:$0xff] }
 0x2c8   :  { %v145_v25 = vpop.permute.xlu1 %144 }
 0x2c9   :  { %148 = vst.msk [vmem:[#allocation2] sm:$0x3] %vm147_vm1, %v145_v25  ;;  %1649 = vmatmul.mubr.msk.f32.vlgmr.msra.gmra.mrb[0].mxu1 %vm44_vm2, %v145_v25  ;;  %v37_v25 = vld [vmem:[%s2309_s4 + $0x18] sm:$0xff] }
 0x2ca   :  { %1825 = vmatpush3.bf16.msra.mxu1 %v1806_v5  ;;  %1670 = vmatprep.mubr.msk.f32.mxu1 %vm1987_vm0, %v1988_v4 }
 0x2cb   :  { %1826 = vmatprep.subr.bf16.mxu1 %v1986_v0 }
 0x2ce   :  { %1828 = vmatpush3.bf16.msra.mxu1 %v1809_v7 }
 0x2cf   :  { %1835 = vmatprep.subr.bf16.mxu1 %v1986_v0 }
 0x39c   :  { %v219_v27 = vpop.f32.mrb[0].mxu1 }
 0x39d   :  { %v223_v28 = vadd.f32 %v1518_v26, %v219_v27  ;;  %v1650_v29 = vpop.f32.mrb[1].mxu1  ;;  %v2140_v27 = vpack.c.bf16 %v37_v25, %v36_v24 }
 0x39e   :  { %v39_v29 = vld [vmem:[%s2310_s5 + $0x8] sm:$0xff] }
 0x39f   :  { %1914 = vtanh.f32 %v223_v28  ;;  %v1520_v31 = vmul.f32 -1.442695, %v223_v28  ;;  %v38_v28 = vld [vmem:[%s2310_s5] sm:$0xff] }
 0x3a1   :  { %1916 = vpow2.f32 %v1520_v31  ;;  %v40_v31 = vld [vmem:[%s2310_s5 + $0x10] sm:$0xff] }
 0x3a9   :  { %v1915_v30 = vpop.eup %1914 }
 0x3aa   :  { %233 = vrot.lane.b32.xlu0 %v1915_v30, %s1989_s10  ;;  %v2151_v30 = vpack.c.bf16 %v39_v29, %v38_v28 }
 0x3ab   :  { %v1917_v32 = vpop.eup %1916 }
 0x3ac   :  { %v227_v33 = vadd.f32 1.0, %v1917_v32  ;;  %v41_v32 = vld [vmem:[%s2310_s5 + $0x18] sm:$0xff] }
 0x3ae   :  { %1918 = vrcp.f32 %v227_v33 }
 0x3b8   :  { %v1919_v34 = vpop.eup %1918 }
 0x3b9   :  { %v231_v37 = vmul.f32 %v1919_v34, %v136_v21  ;;  %v35_v21 = vld [vmem:[%s2309_s4 + $0x8] sm:$0xff] }
 0x3ba   :  { %v2130_v22 = vpack.c.bf16 %v35_v21, %v34_v20 }
 0x41c   :  { %v234_v35 = vpop.permute.xlu0 %233 }
 0x41d   :  { %v236_v36 = vmul.f32 %v1919_v34, %v234_v35 }
 0x41f   :  { %238 = vrot.lane.b32.xlu1 %v236_v36, %s1990_s11 }
 0x491   :  { %v239_v38 = vpop.permute.xlu1 %238 }
 0x492   :  { %v241_v39 = vadd.f32 %v239_v38, %v231_v37  ;;  %v1524_v37 = vld [vmem:[%s2306_s0 + $0x6] sm:$0x3] }
 0x494   :  { %1920 = vtanh.f32 %v241_v39 }
 0x49e   :  { %v1921_v40 = vpop.eup %1920 }
 0x49f   :  { %244 = vrot.lane.b32.xlu0 %v1921_v40, %s1989_s10 }
 0x511   :  { %v245_v41 = vpop.permute.xlu0 %244 }
 0x512   :  { %v247_v42 = vmul.f32 %v1919_v34, %v245_v41  ;;  %v2162_v34 = vpack.c.bf16 %v41_v32, %v40_v31 }
 0x514   :  { %249 = vrot.lane.b32.xlu1 %v247_v42, %s1990_s11 }
 0x586   :  { %v250_v48 = vpop.permute.xlu1 %249 }
 0x587   :  { %253 = vst.msk [vmem:[#allocation2 + $0x2] sm:$0x3] %vm147_vm1, %v250_v48  ;;  %1660 = vmatmul.mubr.msk.f32.vlgmr.msra.gmra.mrb[2].mxu0 %vm44_vm2, %v250_v48 }
 0x588   :  { %1831 = vmatpush3.bf16.msra.mxu0 %v2084_v45  ;;  %1681 = vmatprep.mubr.msk.f32.mxu0 %vm1987_vm0, %v1988_v4 }
 0x589   :  { %1832 = vmatprep.subr.bf16.mxu0 %v1986_v0 }
 0x58c   :  { %1834 = vmatpush3.bf16.msra.mxu0 %v2095_v49 }
 0x58d   :  { %1841 = vmatprep.subr.bf16.mxu0 %v1986_v0 }
 0x58f   :  { %1682 = vmatmul.mubr.f32.vlgmr.msra.gmra.mrb[4].mxu0 %v1988_v4 }
 0x590   :  { %1703 = vmatprep.mubr.msk.f32.mxu0 %vm1987_vm0, %v1988_v4  ;;  %1843 = vmatpush3.bf16.msra.mxu0 %v2130_v22 }
 0x591   :  { %1844 = vmatprep.subr.bf16.mxu0 %v1986_v0 }
 0x594   :  { %1846 = vmatpush3.bf16.msra.mxu0 %v2140_v27 }
 0x595   :  { %1853 = vmatprep.subr.bf16.mxu0 %v1986_v0 }
 0x65a   :  { %v324_v51 = vpop.f32.mrb[2].mxu0 }
 0x65b   :  { %v328_v52 = vadd.f32 %v1521_v50, %v324_v51  ;;  %v1661_v53 = vpop.f32.mrb[3].mxu0 }
 0x65d   :  { %1922 = vtanh.f32 %v328_v52  ;;  %v1523_v60 = vmul.f32 -1.442695, %v328_v52 }
 0x662   :  { %v532_v55 = vpop.f32.mrb[4].mxu0 }
 0x663   :  { %v536_v56 = vadd.f32 %v1527_v54, %v532_v55  ;;  %v1683_v57 = vpop.f32.mrb[5].mxu0 }
 0x665   :  { %1924 = vtanh.f32 %v536_v56  ;;  %v1528_v61 = vmul.f32 -1.442695, %v536_v56 }
 0x666   :  { %1926 = vpow2.f32 %v1523_v60 }
 0x667   :  { %v1923_v58 = vpop.eup %1922  ;;  %1928 = vpow2.f32 %v1528_v61 }
 0x668   :  { %338 = vrot.lane.b32.xlu0 %v1923_v58, %s1989_s10 }
 0x66f   :  { %v1925_v59 = vpop.eup %1924 }
 0x670   :  { %546 = vrot.lane.b32.xlu1 %v1925_v59, %s1989_s10  ;;  %v1927_v62 = vpop.eup %1926 }
 0x671   :  { %v332_v63 = vadd.f32 1.0, %v1927_v62  ;;  %v1929_v1 = vpop.eup %1928 }
 0x672   :  { %v540_v2 = vadd.f32 1.0, %v1929_v1 }
 0x673   :  { %1930 = vrcp.f32 %v332_v63 }
 0x674   :  { %1932 = vrcp.f32 %v540_v2 }
 0x67d   :  { %v1931_v3 = vpop.eup %1930 }
 0x67e   :  { %v1933_v7 = vpop.eup %1932  ;;  %v336_v10 = vmul.f32 %v1931_v3, %v241_v39 }
 0x67f   :  { %v544_v13 = vmul.f32 0.0, %v1933_v7 }
 0x6da   :  { %v339_v5 = vpop.permute.xlu0 %338 }
 0x6db   :  { %v341_v6 = vmul.f32 %v1931_v3, %v339_v5 }
 0x6dd   :  { %343 = vrot.lane.b32.xlu0 %v341_v6, %s1990_s11 }
 0x6e2   :  { %v547_v8 = vpop.permute.xlu1 %546 }
 0x6e3   :  { %v549_v9 = vmul.f32 %v1933_v7, %v547_v8 }
 0x6e5   :  { %551 = vrot.lane.b32.xlu1 %v549_v9, %s1990_s11 }
 0x74f   :  { %v344_v11 = vpop.permute.xlu0 %343 }
 0x750   :  { %v2115_v12 = vadd.f32 %v344_v11, %v336_v10 }
 0x752   :  { %1934 = vtanh.f32 %v2115_v12 }
 0x757   :  { %v552_v14 = vpop.permute.xlu1 %551 }
 0x758   :  { %v2118_v15 = vadd.f32 %v552_v14, %v544_v13 }
 0x75a   :  { %1936 = vtanh.f32 %v2118_v15 }
 0x75c   :  { %v1935_v16 = vpop.eup %1934 }
 0x75d   :  { %349 = vrot.lane.b32.xlu0 %v1935_v16, %s1989_s10 }
 0x764   :  { %v1937_v17 = vpop.eup %1936 }
 0x765   :  { %557 = vrot.lane.b32.xlu1 %v1937_v17, %s1989_s10 }
 0x7cf   :  { %v350_v18 = vpop.permute.xlu0 %349 }
 0x7d0   :  { %v352_v19 = vmul.f32 %v1931_v3, %v350_v18  ;;  %v1090_v18 = vld [vmem:[#allocation2 + $0x2] sm:$0x3] }
 0x7d2   :  { %354 = vrot.lane.b32.xlu0 %v352_v19, %s1990_s11 }
 0x7d7   :  { %v558_v23 = vpop.permute.xlu1 %557 }
 0x7d8   :  { %v560_v26 = vmul.f32 %v1933_v7, %v558_v23 }
 0x7da   :  { %563 = vrot.lane.b32.xlu1 %v560_v26, %s1990_s11  ;;  %v1539_v26 = vld [vmem:[%s2308_s1 + $0x2] sm:$0x3] }
 0x844   :  { %v355_v33 = vpop.permute.xlu0 %354 }
 0x845   :  { %358 = vst.msk [vmem:[#allocation2 + $0x4] sm:$0x3] %vm147_vm1, %v355_v33  ;;  %1671 = vmatmul.mubr.msk.f32.vlgmr.msra.gmra.mrb[2].mxu1 %vm44_vm2, %v355_v33 }
 0x846   :  { %1837 = vmatpush3.bf16.msra.mxu1 %v2151_v30  ;;  %1692 = vmatprep.mubr.msk.f32.mxu1 %vm1987_vm0, %v1988_v4 }
 0x847   :  { %1838 = vmatprep.subr.bf16.mxu1 %v1986_v0 }
 0x84a   :  { %1840 = vmatpush3.bf16.msra.mxu1 %v2162_v34 }
 0x84b   :  { %1847 = vmatprep.subr.bf16.mxu1 %v1986_v0 }
 0x84c   :  { %v564_v35 = vpop.permute.xlu1 %563  ;;  %v829_v36 = vld [vmem:[#allocation2 + $0x4] sm:$0x3] }
 0x84d   :  { %1693 = vmatmul.mubr.msk.f32.vlgmr.msra.gmra.mrb[4].mxu1 %vm44_vm2, %v564_v35 }
 0x84e   :  { %1849 = vmatpush3.bf16.msra.mxu1 %v2084_v45  ;;  %1714 = vmatprep.mubr.msk.f32.mxu1 %vm1987_vm0, %v1988_v4 }
 0x84f   :  { %1850 = vmatprep.subr.bf16.mxu1 %v1986_v0 }
 0x852   :  { %1852 = vmatpush3.bf16.msra.mxu1 %v2095_v49 }
 0x853   :  { %1859 = vmatprep.subr.bf16.mxu1 %v1986_v0 }
 0x855   :  { %1715 = vmatmul.mubr.msk.f32.vlgmr.msra.gmra.mrb[6].mxu1 %vm44_vm2, %v564_v35 }
 0x856   :  { %1861 = vmatpush3.bf16.msra.mxu1 %v2130_v22  ;;  %1736 = vmatprep.mubr.msk.f32.mxu1 %vm1987_vm0, %v1988_v4 }
 0x857   :  { %1862 = vmatprep.subr.bf16.mxu1 %v1986_v0 }
 0x85a   :  { %1864 = vmatpush3.bf16.msra.mxu1 %v2140_v27 }
 0x85b   :  { %1871 = vmatprep.subr.bf16.mxu1 %v1986_v0 }
 0x85d   :  { %1737 = vmatmul.mubr.msk.f32.vlgmr.msra.gmra.mrb[8].mxu1 %vm44_vm2, %v829_v36 }
 0x85e   :  { %1873 = vmatpush3.bf16.msra.mxu1 %v2151_v30  ;;  %1758 = vmatprep.mubr.msk.f32.mxu1 %vm1987_vm0, %v1988_v4 }
 0x85f   :  { %1874 = vmatprep.subr.bf16.mxu1 %v1986_v0 }
 0x862   :  { %1876 = vmatpush3.bf16.msra.mxu1 %v2162_v34 }
 0x863   :  { %1883 = vmatprep.subr.bf16.mxu1 %v1986_v0 }
 0x918   :  { %v429_v38 = vpop.f32.mrb[2].mxu1 }
 0x919   :  { %v433_v39 = vadd.f32 %v1524_v37, %v429_v38  ;;  %v1672_v40 = vpop.f32.mrb[3].mxu1 }
 0x91b   :  { %1938 = vtanh.f32 %v433_v39  ;;  %v1526_v53 = vmul.f32 -1.442695, %v433_v39 }
 0x920   :  { %v2193_v41 = vpop.f32.mrb[4].mxu1 }
 0x921   :  { %v1694_v42 = vpop.f32.mrb[5].mxu1 }
 0x925   :  { %v1939_v43 = vpop.eup %1938 }
 0x926   :  { %443 = vrot.lane.b32.xlu0 %v1939_v43, %s1989_s10 }
 0x928   :  { %v800_v46 = vpop.f32.mrb[6].mxu1 }
 0x929   :  { %v804_v47 = vadd.f32 %v1533_v44, %v800_v46  ;;  %v1716_v48 = vpop.f32.mrb[7].mxu1 }
 0x92b   :  { %1940 = vtanh.f32 %v804_v47  ;;  %v1535_v55 = vmul.f32 -1.442695, %v804_v47 }
 0x92c   :  { %1942 = vpow2.f32 %v1526_v53 }
 0x92d   :  { %1944 = vpow2.f32 %v1535_v55 }
 0x930   :  { %v2199_v50 = vpop.f32.mrb[8].mxu1 }
 0x931   :  { %v1738_v51 = vpop.f32.mrb[9].mxu1 }
 0x935   :  { %v1941_v52 = vpop.eup %1940 }
 0x936   :  { %814 = vrot.lane.b32.xlu1 %v1941_v52, %s1989_s10  ;;  %v1943_v54 = vpop.eup %1942 }
 0x937   :  { %v437_v56 = vadd.f32 1.0, %v1943_v54  ;;  %v1945_v57 = vpop.eup %1944 }
 0x938   :  { %v808_v61 = vadd.f32 1.0, %v1945_v57 }
 0x939   :  { %1946 = vrcp.f32 %v437_v56 }
 0x93a   :  { %1948 = vrcp.f32 %v808_v61 }
 0x943   :  { %v1947_v58 = vpop.eup %1946 }
 0x944   :  { %v1949_v62 = vpop.eup %1948  ;;  %v441_v2 = vmul.f32 %v1947_v58, %v2115_v12 }
 0x945   :  { %v812_v7 = vmul.f32 %v1949_v62, %v2118_v15 }
 0x998   :  { %v444_v59 = vpop.permute.xlu0 %443 }
 0x999   :  { %v446_v60 = vmul.f32 %v1947_v58, %v444_v59 }
 0x99b   :  { %448 = vrot.lane.b32.xlu0 %v446_v60, %s1990_s11 }
 0x9a8   :  { %v815_v63 = vpop.permute.xlu1 %814 }
 0x9a9   :  { %v817_v1 = vmul.f32 %v1949_v62, %v815_v63 }
 0x9ab   :  { %819 = vrot.lane.b32.xlu1 %v817_v1, %s1990_s11  ;;  %v1531_v1 = vld [vmem:[%s2311_s6] ss:$0 sm:$0xff] }
 0xa0d   :  { %v449_v3 = vpop.permute.xlu0 %448 }
 0xa0e   :  { %v451_v5 = vadd.f32 %v449_v3, %v441_v2 }
 0xa10   :  { %1950 = vtanh.f32 %v451_v5 }
 0xa1a   :  { %v1951_v6 = vpop.eup %1950 }
 0xa1b   :  { %454 = vrot.lane.b32.xlu0 %v1951_v6, %s1989_s10 }
 0xa1d   :  { %v820_v8 = vpop.permute.xlu1 %819 }
 0xa1e   :  { %v822_v9 = vadd.f32 %v820_v8, %v812_v7 }
 0xa20   :  { %1952 = vtanh.f32 %v822_v9 }
 0xa2a   :  { %v1953_v10 = vpop.eup %1952 }
 0xa2b   :  { %825 = vrot.lane.b32.xlu1 %v1953_v10, %s1989_s10 }
 0xa8d   :  { %v455_v11 = vpop.permute.xlu0 %454 }
 0xa8e   :  { %v457_v13 = vmul.f32 %v1947_v58, %v455_v11 }
 0xa90   :  { %459 = vrot.lane.b32.xlu0 %v457_v13, %s1990_s11 }
 0xa9d   :  { %v826_v14 = vpop.permute.xlu1 %825 }
 0xa9e   :  { %v828_v12 = vmul.f32 %v1949_v62, %v826_v14 }
 0xaa0   :  { %831 = vrot.lane.b32.xlu1 %v828_v12, %s1990_s11 }
 0xb02   :  { %v460_v16 = vpop.permute.xlu0 %459 }
 0xb03   :  { %463 = vst.msk [vmem:[#allocation2 + $0x6] sm:$0x3] %vm147_vm1, %v460_v16 }
 0xb0a   :  { %v561_v17 = vld [vmem:[#allocation2 + $0x6] sm:$0x3] }
 0xb0b   :  { %1704 = vmatmul.mubr.msk.f32.vlgmr.msra.gmra.mrb[6].mxu0 %vm44_vm2, %v561_v17 }
 0xb0c   :  { %1855 = vmatpush3.bf16.msra.mxu0 %v2151_v30  ;;  %1725 = vmatprep.mubr.msk.f32.mxu0 %vm1987_vm0, %v1988_v4 }
 0xb0d   :  { %1856 = vmatprep.subr.bf16.mxu0 %v1986_v0 }
 0xb10   :  { %1858 = vmatpush3.bf16.msra.mxu0 %v2162_v34 }
 0xb11   :  { %1865 = vmatprep.subr.bf16.mxu0 %v1986_v0 }
 0xb12   :  { %v832_v15 = vpop.permute.xlu1 %831 }
 0xb13   :  { %1726 = vmatmul.mubr.msk.f32.vlgmr.msra.gmra.mrb[8].mxu0 %vm44_vm2, %v832_v15 }
 0xb14   :  { %1867 = vmatpush3.bf16.msra.mxu0 %v2084_v45  ;;  %1747 = vmatprep.mubr.msk.f32.mxu0 %vm1987_vm0, %v1988_v4 }
 0xb15   :  { %1868 = vmatprep.subr.bf16.mxu0 %v1986_v0 }
 0xb18   :  { %1870 = vmatpush3.bf16.msra.mxu0 %v2095_v49 }
 0xb19   :  { %1877 = vmatprep.subr.bf16.mxu0 %v1986_v0 }
 0xb1b   :  { %1748 = vmatmul.mubr.msk.f32.vlgmr.msra.gmra.mrb[10].mxu0 %vm44_vm2, %v832_v15 }
 0xb1c   :  { %1879 = vmatpush3.bf16.msra.mxu0 %v2130_v22  ;;  %1769 = vmatprep.mubr.msk.f32.mxu0 %vm1987_vm0, %v1988_v4 }
 0xb1d   :  { %1880 = vmatprep.subr.bf16.mxu0 %v1986_v0 }
 0xb20   :  { %1882 = vmatpush3.bf16.msra.mxu0 %v2140_v27 }
 0xb21   :  { %1889 = vmatprep.subr.bf16.mxu0 %v1986_v0 }
 0xb23   :  { %1770 = vmatmul.mubr.msk.f32.vlgmr.msra.gmra.mrb[12].mxu0 %vm44_vm2, %v1090_v18 }
 0xb24   :  { %1891 = vmatpush3.bf16.msra.mxu0 %v2151_v30  ;;  %1791 = vmatprep.mubr.msk.f32.mxu0 %vm1987_vm0, %v1988_v4 }
 0xb25   :  { %1892 = vmatprep.subr.bf16.mxu0 %v1986_v0 }
 0xb28   :  { %1894 = vmatpush3.bf16.msra.mxu0 %v2162_v34 }
 0xbde   :  { %v706_v19 = vpop.f32.mrb[6].mxu0 }
 0xbdf   :  { %v2239_v20 = vadd.f32 %v706_v19, %v2193_v41  ;;  %v1705_v21 = vpop.f32.mrb[7].mxu0 }
 0xbe1   :  { %v716_v2 = vadd.f32 %v1531_v1, %v2239_v20 }
 0xbe3   :  { %v718_v3 = vsel %vm717_vm3, %v716_v2, -inf }
 0xbe6   :  { %v901_v23 = vpop.f32.mrb[8].mxu0 }
 0xbe7   :  { %v2242_v24 = vadd.f32 %v2199_v50, %v901_v23  ;;  %v1727_v25 = vpop.f32.mrb[9].mxu0 }
 0xbee   :  { %v1061_v28 = vpop.f32.mrb[10].mxu0 }
 0xbef   :  { %v1065_v29 = vadd.f32 %v1539_v26, %v1061_v28  ;;  %v1749_v30 = vpop.f32.mrb[11].mxu0 }
 0xbf1   :  { %1954 = vtanh.f32 %v1065_v29  ;;  %v1541_v34 = vmul.f32 -1.442695, %v1065_v29 }
 0xbf3   :  { %1956 = vpow2.f32 %v1541_v34 }
 0xbf6   :  { %v1235_v31 = vpop.f32.mrb[12].mxu0 }
 0xbf7   :  { %v1771_v32 = vpop.f32.mrb[13].mxu0 }
 0xbfb   :  { %v1955_v33 = vpop.eup %1954 }
 0xbfc   :  { %1075 = vrot.lane.b32.xlu0 %v1955_v33, %s1989_s10 }
 0xbfd   :  { %v1957_v35 = vpop.eup %1956 }
 0xbfe   :  { %v1069_v36 = vadd.f32 1.0, %v1957_v35 }
 0xc00   :  { %1958 = vrcp.f32 %v1069_v36 }
 0xc0a   :  { %v1959_v37 = vpop.eup %1958 }
 0xc0b   :  { %v1073_v40 = vmul.f32 %v1959_v37, %v822_v9  ;;  %v978_v9 = vadd.f32 %v1531_v1, %v2242_v24 }
 0xc0d   :  { %v979_v10 = vsel %vm717_vm3, %v978_v9, -inf }
 0xc6e   :  { %v1076_v38 = vpop.permute.xlu0 %1075 }
 0xc6f   :  { %v1078_v39 = vmul.f32 %v1959_v37, %v1076_v38 }
 0xc71   :  { %1080 = vrot.lane.b32.xlu1 %v1078_v39, %s1990_s11 }
 0xce3   :  { %v1081_v41 = vpop.permute.xlu1 %1080 }
 0xce4   :  { %v1083_v42 = vadd.f32 %v1081_v41, %v1073_v40 }
 0xce6   :  { %1960 = vtanh.f32 %v1083_v42 }
 0xcf0   :  { %v1961_v43 = vpop.eup %1960 }
 0xcf1   :  { %1086 = vrot.lane.b32.xlu0 %v1961_v43, %s1989_s10 }
 0xd63   :  { %v1087_v44 = vpop.permute.xlu0 %1086 }
 0xd64   :  { %v1089_v46 = vmul.f32 %v1959_v37, %v1087_v44 }
 0xd66   :  { %1092 = vrot.lane.b32.xlu1 %v1089_v46, %s1990_s11 }
 0xdd8   :  { %v1093_v47 = vpop.permute.xlu1 %1092 }
 0xdd9   :  { %1759 = vmatmul.mubr.msk.f32.vlgmr.msra.gmra.mrb[10].mxu1 %vm44_vm2, %v1093_v47 }
 0xdda   :  { %1885 = vmatpush3.bf16.msra.mxu1 %v2084_v45  ;;  %1780 = vmatprep.mubr.msk.f32.mxu1 %vm1987_vm0, %v1988_v4  ;;  %v1350_v45 = vld [vmem:[#allocation2] sm:$0x3] }
 0xddb   :  { %1886 = vmatprep.subr.bf16.mxu1 %v1986_v0 }
 0xdde   :  { %1888 = vmatpush3.bf16.msra.mxu1 %v2095_v49  ;;  %v1254_v49 = vld [vmem:[%s2308_s1] sm:$0x3] }
 0xddf   :  { %1895 = vmatprep.subr.bf16.mxu1 %v1986_v0 }
 0xde1   :  { %1781 = vmatmul.mubr.msk.f32.vlgmr.msra.gmra.mrb[12].mxu1 %vm44_vm2, %v1093_v47 }
 0xde2   :  { %1897 = vmatpush3.bf16.msra.mxu1 %v2130_v22  ;;  %1802 = vmatprep.mubr.msk.f32.mxu1 %vm1987_vm0, %v1988_v4 }
 0xde3   :  { %1898 = vmatprep.subr.bf16.mxu1 %v1986_v0 }
 0xde6   :  { %1900 = vmatpush3.bf16.msra.mxu1 %v2140_v27 }
 0xde9   :  { %1803 = vmatmul.mubr.msk.f32.vlgmr.msra.gmra.mrb[14].mxu1 %vm44_vm2, %v1350_v45 }
 0xeac   :  { %v1162_v48 = vpop.f32.mrb[10].mxu1 }
 0xead   :  { %v1236_v50 = vadd.f32 %v1235_v31, %v1162_v48  ;;  %v1760_v51 = vpop.f32.mrb[11].mxu1 }
 0xeaf   :  { %v1239_v5 = vadd.f32 %v1531_v1, %v1236_v50 }
 0xeb1   :  { %v1240_v6 = vsel %vm717_vm3, %v1239_v5, -inf }
 0xeb4   :  { %v1321_v52 = vpop.f32.mrb[12].mxu1 }
 0xeb5   :  { %v1325_v53 = vadd.f32 %v1321_v52, %v1254_v49  ;;  %v1782_v22 = vpop.f32.mrb[13].mxu1 }
 0xeb7   :  { %1962 = vtanh.f32 %v1325_v53  ;;  %v1546_v27 = vmul.f32 -1.442695, %v1325_v53 }
 0xeb9   :  { %1964 = vpow2.f32 %v1546_v27 }
 0xebc   :  { %v2268_v54 = vpop.f32.mrb[14].mxu1 }
 0xebd   :  { %v1804_v4 = vpop.f32.mrb[15].mxu1 }
 0xec1   :  { %v1963_v0 = vpop.eup %1962 }
 0xec2   :  { %1335 = vrot.lane.b32.xlu0 %v1963_v0, %s1989_s10 }
 0xec3   :  { %v1965_v55 = vpop.eup %1964 }
 0xec4   :  { %v1329_v56 = vadd.f32 1.0, %v1965_v55 }
 0xec6   :  { %1966 = vrcp.f32 %v1329_v56 }
 0xed0   :  { %v1967_v57 = vpop.eup %1966 }
 0xed1   :  { %v1333_v60 = vmul.f32 %v1967_v57, %v1083_v42 }
 0xf34   :  { %v1336_v58 = vpop.permute.xlu0 %1335 }
 0xf35   :  { %v1338_v59 = vmul.f32 %v1967_v57, %v1336_v58 }
 0xf37   :  { %1340 = vrot.lane.b32.xlu1 %v1338_v59, %s1990_s11 }
 0xfa9   :  { %v1341_v61 = vpop.permute.xlu1 %1340 }
 0xfaa   :  { %v1343_v62 = vadd.f32 %v1341_v61, %v1333_v60 }
 0xfac   :  { %1968 = vtanh.f32 %v1343_v62 }
 0xfb6   :  { %v1969_v63 = vpop.eup %1968 }
 0xfb7   :  { %1346 = vrot.lane.b32.xlu0 %v1969_v63, %s1989_s10 }
 0xfd6   :  { %719 = vmax.xlane.f32.xlu0 %v718_v3 }
 0xfda   :  { %1241 = vmax.xlane.f32.xlu0 %v1240_v6 }
0x1029   :  { %v1347_v7 = vpop.permute.xlu0 %1346 }
0x102a   :  { %v1349_v8 = vmul.f32 %v1967_v57, %v1347_v7 }
0x102c   :  { %1352 = vrot.lane.b32.xlu1 %v1349_v8, %s1990_s11 }
0x1050   :  { %980 = vmax.xlane.f32.xlu1 %v979_v10 }
0x1063   :  { %v720_v11 = vpop.xlane.xlu0 %719 }
0x1064   :  { %v721_v13 = vsub.f32 %v716_v2, %v720_v11 }
0x1066   :  { %v722_v14 = vmul.f32 1.442695, %v721_v13 }
0x1067   :  { %v1242_v12 = vpop.xlane.xlu0 %1241 }
0x1068   :  { %1970 = vpow2.f32 %v722_v14  ;;  %v1243_v16 = vsub.f32 %v1239_v5, %v1242_v12 }
0x106a   :  { %v1244_v17 = vmul.f32 1.442695, %v1243_v16 }
0x106c   :  { %1972 = vpow2.f32 %v1244_v17 }
0x1072   :  { %v1971_v15 = vpop.eup %1970 }
0x1073   :  { %v724_v18 = vsel %vm717_vm3, %v1971_v15, 0.0 }
0x1074   :  { %725 = vadd.xlane.f32.xlu1 %v724_v18 }
0x1076   :  { %v1973_v19 = vpop.eup %1972 }
0x1077   :  { %v1246_v20 = vsel %vm717_vm3, %v1973_v19, 0.0 }
0x1078   :  { %1247 = vadd.xlane.f32.xlu1 %v1246_v20 }
0x109e   :  { %v1353_v21 = vpop.permute.xlu1 %1352 }
0x109f   :  { %1792 = vmatmul.mubr.msk.f32.vlgmr.msra.gmra.mrb[14].mxu0 %vm44_vm2, %v1353_v21 }
0x10dd   :  { %v981_v23 = vpop.xlane.xlu1 %980 }
0x10de   :  { %v982_v33 = vsub.f32 %v978_v9, %v981_v23 }
0x10e0   :  { %v983_v34 = vmul.f32 1.442695, %v982_v33 }
0x1101   :  { %v726_v24 = vpop.xlane.xlu1 %725 }
0x1102   :  { %1974 = vlog2.f32 %v726_v24 }
0x1105   :  { %v1248_v25 = vpop.xlane.xlu1 %1247 }
0x1106   :  { %1976 = vlog2.f32 %v1248_v25 }
0x1107   :  { %1978 = vpow2.f32 %v983_v34 }
0x110c   :  { %v1975_v26 = vpop.eup %1974 }
0x110d   :  { %v728_v28 = vmul.f32 0.6931472, %v1975_v26 }
0x110f   :  { %v729_v29 = vsub.f32 %v721_v13, %v728_v28 }
0x1110   :  { %v1977_v30 = vpop.eup %1976 }
0x1111   :  { %1532 = vst.msk [vmem:[%s2312_s7 + $0x6] sm:$0x3] %vm717_vm3, %v729_v29  ;;  %v1250_v31 = vmul.f32 0.6931472, %v1977_v30  ;;  %v1979_v40 = vpop.eup %1978 }
0x1112   :  { %v985_v41 = vsel %vm717_vm3, %v1979_v40, 0.0 }
0x1113   :  { %v1251_v32 = vsub.f32 %v1243_v16, %v1250_v31 }
0x1115   :  { %1544 = vst.msk [vmem:[%s2312_s7 + $0x2] sm:$0x3] %vm717_vm3, %v1251_v32 }
0x1172   :  { %v1422_v35 = vpop.f32.mrb[14].mxu0 }
0x1173   :  { %v1496_v36 = vadd.f32 %v2268_v54, %v1422_v35  ;;  %v1793_v37 = vpop.f32.mrb[15].mxu0 }
0x1175   :  { %v1499_v38 = vadd.f32 %v1531_v1, %v1496_v36 }
0x1177   :  { %v1500_v39 = vsel %vm717_vm3, %v1499_v38, -inf }
0x1178   :  { %1501 = vmax.xlane.f32.xlu0 %v1500_v39 }
0x117c   :  { %986 = vadd.xlane.f32.xlu0 %v985_v41 }
0x1205   :  { %v1502_v42 = vpop.xlane.xlu0 %1501 }
0x1206   :  { %v1503_v43 = vsub.f32 %v1499_v38, %v1502_v42 }
0x1208   :  { %v1504_v44 = vmul.f32 1.442695, %v1503_v43 }
0x1209   :  { %v987_v46 = vpop.xlane.xlu0 %986 }
0x120a   :  { %1980 = vpow2.f32 %v1504_v44 }
0x120b   :  { %1982 = vlog2.f32 %v987_v46 }
0x1214   :  { %v1981_v47 = vpop.eup %1980 }
0x1215   :  { %v1983_v45 = vpop.eup %1982  ;;  %v1506_v48 = vsel %vm717_vm3, %v1981_v47, 0.0 }
0x1216   :  { %v989_v50 = vmul.f32 0.6931472, %v1983_v45  ;;  %1507 = vadd.xlane.f32.xlu0 %v1506_v48 }
0x1218   :  { %v990_v51 = vsub.f32 %v982_v33, %v989_v50 }
0x121a   :  { %1538 = vst.msk [vmem:[%s2312_s7 + $0x4] sm:$0x3] %vm717_vm3, %v990_v51 }
0x12a3   :  { %v1508_v49 = vpop.xlane.xlu0 %1507 }
0x12a4   :  { %1984 = vlog2.f32 %v1508_v49 }
0x12ae   :  { %v1985_v52 = vpop.eup %1984 }
0x12af   :  { %v1510_v53 = vmul.f32 0.6931472, %v1985_v52 }
0x12b1   :  { %v1511_v22 = vsub.f32 %v1503_v43, %v1510_v53 }
0x12b3   :  { %1512 = vst.msk [vmem:[%s2312_s7] sm:$0x3] %vm717_vm3, %v1511_v22 }

</bundles_post_ra>
